<compile_context>
chip_gen: v7x
topology: tpu7x:2x2x1
jax: 0.10.0
libtpu: 0.0.40
codegen_flags: <defaults>
</compile_context>

<pallas_src>
import functools

import jax
import jax.numpy as jnp
import numpy as np
from jax import lax
from jax.experimental import pallas as pl
from jax.experimental.pallas import tpu as pltpu

LN_EPS = 1e-5


def _channel_mixing_kernel(x_ref, w1_ref, b1_ref, g_ref, be_ref,
                           w2_ref, b2_ref, o_ref, *, eps):
    # x_ref: (TM, C_in)   w1_ref: (C_in, C_out)   w2_ref: (C_out, C_in)
    x = x_ref[...].astype(jnp.float32)

    # first_linear + Swish
    y = jnp.dot(x, w1_ref[...], preferred_element_type=jnp.float32)
    y = y + b1_ref[...]
    y = y * jax.nn.sigmoid(y)

    # LayerNorm over the feature (lane) axis
    mean = jnp.mean(y, axis=-1, keepdims=True)
    c = y - mean
    var = jnp.mean(c * c, axis=-1, keepdims=True)
    y = c * lax.rsqrt(var + eps) * g_ref[...] + be_ref[...]

    # second_linear + residual
    z = jnp.dot(y, w2_ref[...], preferred_element_type=jnp.float32)
    z = z + b2_ref[...] + x
    o_ref[...] = z.astype(o_ref.dtype)


def channel_mixing(x, params, *, tile_rows=256):
    """x: (..., C_in) float32.  params follow torch.nn naming/shapes."""
    orig_shape = x.shape
    C_in = orig_shape[-1]
    C_out = params["w1"].shape[0]
    assert params["w1"].shape == (C_out, C_in)
    assert params["w2"].shape == (C_in, C_out)

    x2d = x.reshape(-1, C_in)                       # contiguous reshape only
    M = x2d.shape[0]
    TM = min(tile_rows, M)
    assert M % TM == 0 and TM % 8 == 0, (M, TM)

    # Pre-transpose weights so the kernel does plain (rows, Cin)@(Cin, Cout).
    w1t = jnp.transpose(params["w1"]).astype(jnp.float32)     # (C_in, C_out)
    w2t = jnp.transpose(params["w2"]).astype(jnp.float32)     # (C_out, C_in)
    b1 = params["b1"].reshape(1, C_out).astype(jnp.float32)
    b2 = params["b2"].reshape(1, C_in).astype(jnp.float32)
    gamma = params["ln_g"].reshape(1, C_out).astype(jnp.float32)
    beta = params["ln_b"].reshape(1, C_out).astype(jnp.float32)

    out2d = pl.pallas_call(
        functools.partial(_channel_mixing_kernel, eps=LN_EPS),
        out_shape=jax.ShapeDtypeStruct((M, C_in), jnp.float32),
        grid=(M // TM,),
        in_specs=[
            pl.BlockSpec((TM, C_in), lambda i: (i, 0)),        # x tile
            pl.BlockSpec((C_in, C_out), lambda i: (0, 0)),     # W1^T
            pl.BlockSpec((1, C_out), lambda i: (0, 0)),        # b1
            pl.BlockSpec((1, C_out), lambda i: (0, 0)),        # ln gamma
            pl.BlockSpec((1, C_out), lambda i: (0, 0)),        # ln beta
            pl.BlockSpec((C_out, C_in), lambda i: (0, 0)),     # W2^T
            pl.BlockSpec((1, C_in), lambda i: (0, 0)),         # b2
        ],
        out_specs=pl.BlockSpec((TM, C_in), lambda i: (i, 0)),
        compiler_params=pltpu.CompilerParams(
            dimension_semantics=("parallel",)),
    )(x2d, w1t, b1, gamma, beta, w2t, b2)

    return out2d.reshape(orig_shape)


# ----------------------- pure-JAX reference ---------------------------------
def _reference(x, p):
    y = x @ p["w1"].T + p["b1"]
    y = y * jax.nn.sigmoid(y)                       # Swish
    mean = y.mean(-1, keepdims=True)
    var = ((y - mean) ** 2).mean(-1, keepdims=True)  # biased, like torch LN
    y = (y - mean) / jnp.sqrt(var + LN_EPS) * p["ln_g"] + p["ln_b"]
    z = y @ p["w2"].T + p["b2"]
    return z + x


if __name__ == "__main__":
    # Shapes implied by the forward: x is (batch, seq, in_channels).
    B, S, C_in, C_out = 2, 256, 128, 256
    key = jax.random.PRNGKey(0)
    ks = jax.random.split(key, 8)

    x = jax.random.normal(ks[0], (B, S, C_in), jnp.float32)

    params = {
        # torch Linear weight shape: (out_features, in_features)
        "w1": jax.random.normal(ks[1], (C_out, C_in), jnp.float32) / np.sqrt(C_in),
        "b1": 0.1 * jax.random.normal(ks[2], (C_out,), jnp.float32),
        "ln_g": 1.0 + 0.1 * jax.random.normal(ks[3], (C_out,), jnp.float32),
        "ln_b": 0.1 * jax.random.normal(ks[4], (C_out,), jnp.float32),
        "w2": jax.random.normal(ks[5], (C_in, C_out), jnp.float32) / np.sqrt(C_out),
        "b2": 0.1 * jax.random.normal(ks[6], (C_in,), jnp.float32),
    }

    out = jax.block_until_ready(channel_mixing(x, params))
    ref = jax.block_until_ready(_reference(x, params))

    assert out.shape == (B, S, C_in), out.shape
    np.testing.assert_allclose(np.asarray(out), np.asarray(ref),
                               rtol=1e-2, atol=1e-2)
    print("KERNEL_OK")
</pallas_src>

<mosaic_0001>
module attributes {stable_mosaic.version = 11 : i64} {
  func.func @_channel_mixing_kernel(%arg0: i32, %arg1: memref<256x128xf32, #tpu.memory_space<vmem>>, %arg2: memref<128x256xf32, #tpu.memory_space<vmem>>, %arg3: memref<1x256xf32, #tpu.memory_space<vmem>>, %arg4: memref<1x256xf32, #tpu.memory_space<vmem>>, %arg5: memref<1x256xf32, #tpu.memory_space<vmem>>, %arg6: memref<256x128xf32, #tpu.memory_space<vmem>>, %arg7: memref<1x128xf32, #tpu.memory_space<vmem>>, %arg8: memref<256x128xf32, #tpu.memory_space<vmem>>) attributes {dimension_semantics = [#tpu.dimension_semantics<parallel>], iteration_bounds = array<i64: 2>, scalar_prefetch = 0 : i64, scratch_operands = 0 : i64, tpu.core_type = #tpu.core_type<tc>, window_params = [{transform_indices = @transform_0, window_bounds = array<i64: 256, 128>}, {pipeline_mode = #tpu.pipeline_mode<synchronous>, transform_indices = @transform_1, window_bounds = array<i64: 128, 256>}, {pipeline_mode = #tpu.pipeline_mode<synchronous>, transform_indices = @transform_2, window_bounds = array<i64: 1, 256>}, {pipeline_mode = #tpu.pipeline_mode<synchronous>, transform_indices = @transform_3, window_bounds = array<i64: 1, 256>}, {pipeline_mode = #tpu.pipeline_mode<synchronous>, transform_indices = @transform_4, window_bounds = array<i64: 1, 256>}, {pipeline_mode = #tpu.pipeline_mode<synchronous>, transform_indices = @transform_5, window_bounds = array<i64: 256, 128>}, {pipeline_mode = #tpu.pipeline_mode<synchronous>, transform_indices = @transform_6, window_bounds = array<i64: 1, 128>}, {transform_indices = @transform_7, window_bounds = array<i64: 256, 128>}]} {
    %c0 = arith.constant 0 : index
    %c0_0 = arith.constant 0 : index
    %0 = vector.load %arg1[%c0, %c0_0] : memref<256x128xf32, #tpu.memory_space<vmem>>, vector<256x128xf32>
    %c0_1 = arith.constant 0 : index
    %c0_2 = arith.constant 0 : index
    %1 = vector.load %arg2[%c0_1, %c0_2] : memref<128x256xf32, #tpu.memory_space<vmem>>, vector<128x256xf32>
    %cst = arith.constant dense<0.000000e+00> : vector<256x256xf32>
    %2 = tpu.matmul %0, %1, %cst {dimension_numbers = #tpu.dot_dimension_numbers<[1], [0], [0], [1], [0, 0, 1, 1], [], []>} : vector<256x128xf32>, vector<128x256xf32>, vector<256x256xf32> -> vector<256x256xf32>
    %c0_3 = arith.constant 0 : index
    %c0_4 = arith.constant 0 : index
    %3 = vector.load %arg3[%c0_3, %c0_4] : memref<1x256xf32, #tpu.memory_space<vmem>>, vector<1x256xf32>
    %4 = vector.broadcast %3 : vector<1x256xf32> to vector<256x256xf32>
    %5 = arith.addf %2, %4 : vector<256x256xf32>
    %6 = arith.negf %5 : vector<256x256xf32>
    %7 = math.exp %6 : vector<256x256xf32>
    %cst_5 = arith.constant 1.000000e+00 : f32
    %8 = vector.broadcast %cst_5 : f32 to vector<256x256xf32>
    %9 = arith.addf %8, %7 : vector<256x256xf32>
    %10 = arith.divf %8, %9 : vector<256x256xf32>
    %11 = arith.mulf %5, %10 : vector<256x256xf32>
    %cst_6 = arith.constant dense<0.000000e+00> : vector<256xf32>
    %12 = vector.multi_reduction <add>, %11, %cst_6 [1] : vector<256x256xf32> to vector<256xf32>
    %13 = vector.shape_cast %12 : vector<256xf32> to vector<256x1xf32>
    %cst_7 = arith.constant 2.560000e+02 : f32
    %14 = vector.broadcast %cst_7 : f32 to vector<256x1xf32>
    %15 = arith.divf %13, %14 : vector<256x1xf32>
    %16 = vector.broadcast %15 : vector<256x1xf32> to vector<256x256xf32>
    %17 = arith.subf %11, %16 : vector<256x256xf32>
    %18 = arith.mulf %17, %17 : vector<256x256xf32>
    %cst_8 = arith.constant dense<0.000000e+00> : vector<256xf32>
    %19 = vector.multi_reduction <add>, %18, %cst_8 [1] : vector<256x256xf32> to vector<256xf32>
    %20 = vector.shape_cast %19 : vector<256xf32> to vector<256x1xf32>
    %cst_9 = arith.constant 2.560000e+02 : f32
    %21 = vector.broadcast %cst_9 : f32 to vector<256x1xf32>
    %22 = arith.divf %20, %21 : vector<256x1xf32>
    %cst_10 = arith.constant 9.99999974E-6 : f32
    %23 = vector.broadcast %cst_10 : f32 to vector<256x1xf32>
    %24 = arith.addf %22, %23 : vector<256x1xf32>
    %25 = math.rsqrt %24 : vector<256x1xf32>
    %26 = vector.broadcast %25 : vector<256x1xf32> to vector<256x256xf32>
    %27 = arith.mulf %17, %26 : vector<256x256xf32>
    %c0_11 = arith.constant 0 : index
    %c0_12 = arith.constant 0 : index
    %28 = vector.load %arg4[%c0_11, %c0_12] : memref<1x256xf32, #tpu.memory_space<vmem>>, vector<1x256xf32>
    %29 = vector.broadcast %28 : vector<1x256xf32> to vector<256x256xf32>
    %30 = arith.mulf %27, %29 : vector<256x256xf32>
    %c0_13 = arith.constant 0 : index
    %c0_14 = arith.constant 0 : index
    %31 = vector.load %arg5[%c0_13, %c0_14] : memref<1x256xf32, #tpu.memory_space<vmem>>, vector<1x256xf32>
    %32 = vector.broadcast %31 : vector<1x256xf32> to vector<256x256xf32>
    %33 = arith.addf %30, %32 : vector<256x256xf32>
    %c0_15 = arith.constant 0 : index
    %c0_16 = arith.constant 0 : index
    %34 = vector.load %arg6[%c0_15, %c0_16] : memref<256x128xf32, #tpu.memory_space<vmem>>, vector<256x128xf32>
    %cst_17 = arith.constant dense<0.000000e+00> : vector<256x128xf32>
    %35 = tpu.matmul %33, %34, %cst_17 {dimension_numbers = #tpu.dot_dimension_numbers<[1], [0], [0], [1], [0, 0, 1, 1], [], []>} : vector<256x256xf32>, vector<256x128xf32>, vector<256x128xf32> -> vector<256x128xf32>
    %c0_18 = arith.constant 0 : index
    %c0_19 = arith.constant 0 : index
    %36 = vector.load %arg7[%c0_18, %c0_19] : memref<1x128xf32, #tpu.memory_space<vmem>>, vector<1x128xf32>
    %37 = vector.broadcast %36 : vector<1x128xf32> to vector<256x128xf32>
    %38 = arith.addf %35, %37 : vector<256x128xf32>
    %39 = arith.addf %38, %0 : vector<256x128xf32>
    %c0_20 = arith.constant 0 : index
    %c0_21 = arith.constant 0 : index
    %40 = vector.load %arg8[%c0_20, %c0_21] : memref<256x128xf32, #tpu.memory_space<vmem>>, vector<256x128xf32>
    tpu.vector_store %arg8[%c0_20, %c0_21], %39 {strides = array<i32>} : memref<256x128xf32, #tpu.memory_space<vmem>>, vector<256x128xf32>,
    return
  }
  func.func @transform_0(%arg0: i32) -> (i32, i32) {
    %c0_i32 = arith.constant 0 : i32
    %c0_i32_0 = arith.constant 0 : i32
    return %arg0, %c0_i32 : i32, i32
  }
  func.func @transform_1(%arg0: i32) -> (i32, i32) {
    %c0_i32 = arith.constant 0 : i32
    %c0_i32_0 = arith.constant 0 : i32
    %c0_i32_1 = arith.constant 0 : i32
    return %c0_i32, %c0_i32_0 : i32, i32
  }
  func.func @transform_2(%arg0: i32) -> (i32, i32) {
    %c0_i32 = arith.constant 0 : i32
    %c0_i32_0 = arith.constant 0 : i32
    %c0_i32_1 = arith.constant 0 : i32
    return %c0_i32, %c0_i32_0 : i32, i32
  }
  func.func @transform_3(%arg0: i32) -> (i32, i32) {
    %c0_i32 = arith.constant 0 : i32
    %c0_i32_0 = arith.constant 0 : i32
    %c0_i32_1 = arith.constant 0 : i32
    return %c0_i32, %c0_i32_0 : i32, i32
  }
  func.func @transform_4(%arg0: i32) -> (i32, i32) {
    %c0_i32 = arith.constant 0 : i32
    %c0_i32_0 = arith.constant 0 : i32
    %c0_i32_1 = arith.constant 0 : i32
    return %c0_i32, %c0_i32_0 : i32, i32
  }
  func.func @transform_5(%arg0: i32) -> (i32, i32) {
    %c0_i32 = arith.constant 0 : i32
    %c0_i32_0 = arith.constant 0 : i32
    %c0_i32_1 = arith.constant 0 : i32
    return %c0_i32, %c0_i32_0 : i32, i32
  }
  func.func @transform_6(%arg0: i32) -> (i32, i32) {
    %c0_i32 = arith.constant 0 : i32
    %c0_i32_0 = arith.constant 0 : i32
    %c0_i32_1 = arith.constant 0 : i32
    return %c0_i32, %c0_i32_0 : i32, i32
  }
  func.func @transform_7(%arg0: i32) -> (i32, i32) {
    %c0_i32 = arith.constant 0 : i32
    %c0_i32_0 = arith.constant 0 : i32
    return %arg0, %c0_i32 : i32, i32
  }
}

</mosaic_0001>

<bundles_post_ra>
// kernel: tpu_custom_call.1
= control target key start
LH: loop header
LB: loop body
LE: loop exit
PB: predicated region body
PF: predicated region fallthrough
CT: control target
= control target key end

     0   :  { %12 = vsyncpa [#allocation3], 0  ;;  %s4579_s0 = inlined_call_operand.hbm [shape: f32[512,128], index: 0, kind: input, shape index: {}]   ;;  %s4580_s1 = inlined_call_operand.hbm [shape: f32[128,256], index: 1, kind: input, shape index: {}]   ;;  %s4581_s2 = inlined_call_operand.vmem [shape: f32[1,256], index: 2, kind: input, shape index: {}]   ;;  %s4582_s3 = inlined_call_operand.vmem [shape: f32[1,256], index: 3, kind: input, shape index: {}]   ;;  %s4583_s4 = inlined_call_operand.vmem [shape: f32[1,256], index: 4, kind: input, shape index: {}]   ;;  %s4584_s5 = inlined_call_operand.hbm [shape: f32[256,128], index: 5, kind: input, shape index: {}]   ;;  %s4585_s6 = inlined_call_operand.vmem [shape: f32[1,128], index: 6, kind: input, shape index: {}]   ;;  %s4586_s7 = inlined_call_operand.hbm [shape: f32[512,128], index: 7, kind: output, shape index: {}]  }
   0x1   :  { %14 = vsyncpa [#allocation3 + $0x1], 0 }
   0x2   :  { %15 = vsyncpa [#allocation6], 0 }
   0x3   :  { %16 = vsyncpa [#allocation4], 0 }
   0x4   :  { %18 = vsyncpa [#allocation4 + $0x1], 0  ;;  %s3042_s24 = smov 0   ;;  %s3044_s25 = smov 0  }
   0x5   :  { %s3046_s26 = smov 0   ;;  %s3048_s27 = smov 0  }
   0x6 LB: > { %s3063_s28 = sadd.s32 4294967295, %s2988_s27   ;;  %s2208_s29 = sadd.s32 4294967294, %s2988_s27   ;;  %s2988_s27 = sphi %s3048_s27, %s4739_s27   ;;  %s2984_s26 = sphi %s3046_s26, %s4738_s26   ;;  %s2980_s25 = sphi %s3044_s25, %s4737_s25   ;;  %s2976_s24 = sphi %s3042_s24, %s4736_s24  }
   0x7   : > { %p44_p0 = scmp.ne.s32.totalorder %s2980_s25, %s2976_s24  ;;  %p4587_p1 = scmp.eq.s32.totalorder %s3063_s28, 0 }
   0x8   : > { %p200_p3 = scmp.eq.s32.totalorder %s2208_s29, 1  ;;  %p2209_p5 = scmp.ge.s32.totalorder %s2988_s27, 1 }
   0x9   : > { %p3072_p4 = por %p4587_p1, %p44_p0  ;;  %p207_p7 = scmp.lt.s32.totalorder %s2988_s27, 3 }
   0xa   : > { %p3077_p6 = por %p200_p3, %p44_p0  ;;  %s2990_s10 = smov [#allocation5]  }
   0xb   : > { %s4636_s30 = scalar_select %p3072_p4, 1, 0 }
   0xc   : > { %s4637_s8 = scalar_select %p3077_p6, 1, 0 }
   0xd   : > { %p3082_p8 = pnand %p2209_p5, %p207_p7  ;;  %s219_s11 = sshll.u32 %s2990_s10, 4  ;;  %s3086_s11 = int_to_ptr.vmem [resolvable:$true] %s219_s11 }
   0xe   : > { %s2991_s13 = smov [#allocation7]   ;;  %s2832_s17 = scalar_lea.hbm %s4580_s1, 4096 }
   0xf   : > { %p2417_p9 = pneg %p3082_p8  ;;  %s241_s14 = sshll.u32 %s2991_s13, 4  ;;  %s3097_s14 = int_to_ptr.vmem [resolvable:$true] %s241_s14 }
  0x10   : > { %p2833_p12 = scmp.ne.s32.totalorder %s4580_s1, %s2832_s17  ;;  %p2839_p5 = scmp.lt.u32.totalorder %s2832_s17, %s4580_s1 }
  0x11   : > { %p3093_p11 = pnand %p2417_p9, %p4587_p1 }
  0x13   : > { %p2834_p13 = pneg %p3093_p11 }
  0x15   : > { %p2835_p0 = pnand %p2834_p13, %p2833_p12 }
  0x17   : > { %p2836_p3 = pneg %p2835_p0 }
  0x19   : > { %p2841_p7 = pnand %p2839_p5, %p2836_p3 }
  0x1b   : > { %2844 = shalt.err (!%p2841_p7)
}
  0x1c   : > { %s2845_s22 = scalar_lea.vmem %s3086_s11, 4096  ;;  %p2853_p2 = scmp.lt.s32.totalorder %s3086_s11, %s3086_s11 }
  0x1d   : > { %p2846_p9 = scmp.ne.s32.totalorder %s3086_s11, %s2845_s22  ;;  %p2854_p12 = scmp.lt.s32.totalorder %s2845_s22, %s2845_s22 }
  0x1f   : > { %p2848_p10 = pnand %p2846_p9, %p2834_p13  ;;  %p2855_p0 = por %p2854_p12, %p2853_p2 }
  0x21   : > { %p2849_p1 = pneg %p2848_p10 }
  0x23   : > { %p2856_p6 = pnand %p2855_p0, %p2849_p1 }
  0x25   : > { %2859 = shalt.err (!%p2856_p6)
}
  0x26   : > { %s2992_s23 = smov 256   ;;  %s2993_s29 = smov 16  }
  0x27   : > { %2420 = dma.hbm_to_vmem [thread:$0]  (!%p3093_p11), %s4580_s1, 4096, %s3086_s11, [#allocation6], %s2992_s23, %s2992_s23, %s2993_s29  }
  0x28   : > { %s2860_s17 = scalar_lea.hbm %s4584_s5, 4096 }
  0x29   : > { %p2861_p2 = scmp.ne.s32.totalorder %s4584_s5, %s2860_s17  ;;  %p2867_p10 = scmp.lt.u32.totalorder %s2860_s17, %s4584_s5 }
  0x2b   : > { %p2863_p1 = pnand %p2861_p2, %p2834_p13 }
  0x2d   : > { %p2864_p6 = pneg %p2863_p1 }
  0x2f   : > { %p2869_p3 = pnand %p2867_p10, %p2864_p6 }
  0x31   : > { %2872 = shalt.err (!%p2869_p3)
}
  0x32   : > { %s2873_s11 = scalar_lea.vmem %s3097_s14, 4096  ;;  %p2881_p12 = scmp.lt.s32.totalorder %s3097_s14, %s3097_s14 }
  0x33   : > { %p2874_p5 = scmp.ne.s32.totalorder %s3097_s14, %s2873_s11  ;;  %p2882_p0 = scmp.lt.s32.totalorder %s2873_s11, %s2873_s11 }
  0x35   : > { %p2876_p7 = pnand %p2874_p5, %p2834_p13  ;;  %p2883_p2 = por %p2882_p0, %p2881_p12 }
  0x37   : > { %p2877_p9 = pneg %p2876_p7 }
  0x39   : > { %p2884_p1 = pnand %p2883_p2, %p2877_p9 }
  0x3b   : > { %2887 = shalt.err (!%p2884_p1)
}
  0x3c   : > { %s4588_s22 = smov 128   ;;  %s2995_s23 = smov 8  }
  0x3d   : > { %2423 = dma.hbm_to_vmem [thread:$0]  (!%p3093_p11), %s4584_s5, 4096, %s3097_s14, [#allocation6], %s4588_s22, %s4588_s22, %s2995_s23  }
  0x3e   : > { %s3155_s13 = sadd.s32 1, %s2988_s27   ;;  %s31_s16 = sadd.s32 1, %s2984_s26 }
  0x3f   : > { %s28_s15 = ssub.s32 %s2988_s27, %s3155_s13  ;;  %p38_p6 = scmp.ne.s32.totalorder %s2984_s26, %s2980_s25 }
  0x40   : > { %p29_p13 = scmp.eq.s32.totalorder %s28_s15, 0  ;;  %p39_p10 = scmp.eq.s32.totalorder %s2988_s27, 0 }
  0x41   : > { %p4640_p5 = scmp.eq.s32.totalorder %s3063_s28, 1  ;;  %p2434_p9 = scmp.lt.s32.totalorder %s2988_s27, 2 }
  0x42   : > { %s3164_s17 = scalar_select %p29_p13, %s2984_s26, %s31_s16  }
  0x43   : > { %p40_p3 = por %p39_p10, %p38_p6  ;;  %p3168_p7 = por %p4640_p5, %p38_p6 }
  0x44   : > { %s258_s18 = sand.u32 1, %s2984_s26   ;;  %s2291_s14 = sshll.u32 %s2988_s27, 12 }
  0x45   : > { %s4641_s12 = scalar_select %p3168_p7, 1, 0 }
  0x46   : > { %s2213_s19 = sshll.u32 %s258_s18, 8  ;;  %s3178_s11 = scalar_lea.hbm %s4579_s0, %s2291_s14 }
  0x47   : > { %s262_s29 = scalar_lea.vmem [#allocation2], %s2213_s19  ;;  %p3182_p11 = pnand %p2434_p9, %p40_p3 }
  0x48   : > { %s269_s10 = sshll.u32 %s262_s29, 4  ;;  %s3186_s16 = scalar_lea.sflag [#allocation3], %s258_s18  ;;  %s3180_s10 = int_to_ptr.vmem [resolvable:$true] %s269_s10 }
  0x49   : > { %s2888_s22 = scalar_lea.hbm %s3178_s11, 4096  ;;  %p2890_p0 = pneg %p3182_p11 }
  0x4a   : > { %p2889_p12 = scmp.ne.s32.totalorder %s3178_s11, %s2888_s22  ;;  %s2893_s20 = scalar_lea.hbm %s4579_s0, 8192 }
  0x4b   : > { %p2894_p13 = scmp.lt.u32.totalorder %s3178_s11, %s4579_s0  ;;  %p2895_p6 = scmp.lt.u32.totalorder %s2893_s20, %s2888_s22 }
  0x4c   : > { %p2891_p2 = pnand %p2890_p0, %p2889_p12  ;;  %p2897_p3 = scmp.lt.u32.totalorder %s2888_s22, %s3178_s11 }
  0x4d   : > { %p2896_p10 = por %p2895_p6, %p2894_p13 }
  0x4e   : > { %p2892_p1 = pneg %p2891_p2 }
  0x4f   : > { %p2898_p5 = por %p2897_p3, %p2896_p10 }
  0x51   : > { %p2899_p9 = pnand %p2898_p5, %p2892_p1 }
  0x53   : > { %2902 = shalt.err (!%p2899_p9)
}
  0x54   : > { %s2903_s18 = scalar_lea.vmem %s3180_s10, 4096  ;;  %s2996_s19 = smov [#allocation2]  }
  0x55   : > { %p2904_p12 = scmp.ne.s32.totalorder %s3180_s10, %s2903_s18  ;;  %s2908_s14 = sshll.u32 %s2996_s19, 4  ;;  %s2909_s14 = int_to_ptr.vmem [resolvable:$false] %s2908_s14 }
  0x56   : > { %s2910_s21 = scalar_lea.vmem %s2909_s14, 8192  ;;  %p2911_p4 = scmp.lt.s32.totalorder %s3180_s10, %s2909_s14 }
  0x57   : > { %p2906_p2 = pnand %p2904_p12, %p2890_p0  ;;  %p2912_p13 = scmp.lt.s32.totalorder %s2910_s21, %s2903_s18 }
  0x59   : > { %p2907_p7 = pneg %p2906_p2  ;;  %p2913_p6 = por %p2912_p13, %p2911_p4 }
  0x5b   : > { %p2914_p10 = pnand %p2913_p6, %p2907_p7 }
  0x5d   : > { %2917 = shalt.err (!%p2914_p10)
}
  0x5e   : > { %s4643_s22 = smov 128   ;;  %281 = sbr.rel (%p3082_p8) target bundleno = 1129 (0x469), region = 48 }
  0x5f   : > { %2427 = dma.hbm_to_vmem [thread:$0]  (!%p3182_p11), %s3178_s11, 4096, %s3180_s10, %s3186_s16, %s4643_s22, %s4643_s22, %s2995_s23  }
  0x65   : > { %s3220_s20 = sand.u32 1, %s2980_s25   ;;  %p4644_p4 = scmp.ne.s32.totalorder %s4636_s30, 0 }
  0x66   : > { %s2217_s29 = sshll.u32 %s3220_s20, 8  ;;  %s284_s18 = scalar_lea.sflag [#allocation3], %s3220_s20 }
  0x67   : > { %s3226_s15 = scalar_lea.vmem [#allocation2], %s2217_s29 }
  0x68   : > { %2963 = dma.done.wait (%p4644_p4), %s284_s18, 4096  }
  0x69   : > { %2965 = vsyncadd (%p4644_p4), %s284_s18, 4294963200  ;;  %p4645_p7 = scmp.eq.s32.totalorder %s3063_s28, 0 }
  0x6b   : > { %2967 = dma.done.wait (%p4645_p7), [#allocation6], 8192   ;;  %p4646_p8 = pmov %p4645_p7 }
  0x6c   : > { %v2997_v0 = vmov 0.0   ;;  %v361_v1 = vld [vmem:[#allocation5 + $0x8] sm:$0xff]  ;;  %v363_v2 = vld [vmem:[#allocation5 + $0x18] sm:$0xff]  ;;  %v360_v3 = vld [vmem:[#allocation5] sm:$0xff]  ;;  %s4432_s21 = scalar_lea.vmem [#allocation8], %s2217_s29  ;;  %s2292_s22 = sshll.u32 %s3063_s28, 12 }
  0x6d   : > { %2969 = vsyncadd (%p4646_p8), [#allocation6], 4294959104  ;;  %468 = vmatprep.mubr.f32.mxu0 %v2997_v0  ;;  %v2293_v4 = vpack.c.bf16 %v363_v2, %v361_v1  ;;  %v362_v5 = vld [vmem:[#allocation5 + $0x10] sm:$0xff]  ;;  %v365_v6 = vld [vmem:[#allocation5 + $0x28] sm:$0xff]  ;;  %s2116_s29 = sshll.u32 %s4432_s21, 4  ;;  %s4531_s9 = scalar_lea.hbm %s4586_s7, %s2292_s22  ;;  %s4533_s29 = int_to_ptr.vmem [resolvable:$true] %s2116_s29 }
  0x6e   : > { %v367_v7 = vld [vmem:[#allocation5 + $0x38] sm:$0xff]  ;;  %v2295_v8 = vpack.c.bf16 %v362_v5, %v360_v3  ;;  %v364_v10 = vld [vmem:[#allocation5 + $0x20] sm:$0xff]  ;;  %v366_v11 = vld [vmem:[#allocation5 + $0x30] sm:$0xff]  ;;  %s2103_s28 = scalar_lea.sflag [#allocation4], %s3220_s20  ;;  %s2918_s23 = scalar_lea.vmem %s4533_s29, 4096 }
  0x6f   : > { %v2297_v9 = vpack.c.bf16 %v367_v7, %v365_v6  ;;  %v369_v12 = vld [vmem:[#allocation5 + $0x48] sm:$0xff]  ;;  %2294 = vmatprep.subr.bf16.mxu0 %v2293_v4  ;;  %v371_v13 = vld [vmem:[#allocation5 + $0x58] sm:$0xff]  ;;  %v2299_v14 = vpack.c.bf16 %v366_v11, %v364_v10  ;;  %v368_v16 = vld [vmem:[#allocation5 + $0x40] sm:$0xff]  ;;  %p2919_p11 = scmp.ne.s32.totalorder %s4533_s29, %s2918_s23  ;;  %p4733_p0 = scmp.ne.s32.totalorder %s4641_s12, 0 }
  0x70   : > { %2296 = vmatpush1.bf16.msra.mxu0 %v2295_v8  ;;  %v2301_v15 = vpack.c.bf16 %v371_v13, %v369_v12  ;;  %v370_v17 = vld [vmem:[#allocation5 + $0x50] sm:$0xff]  ;;  %v373_v18 = vld [vmem:[#allocation5 + $0x68] sm:$0xff]  ;;  %v375_v19 = vld [vmem:[#allocation5 + $0x78] sm:$0xff]  ;;  %s2999_s11 = smov [#allocation8]  }
  0x71   : > { %2298 = vmatprep.subr.bf16.mxu0 %v2297_v9  ;;  %v2303_v20 = vpack.c.bf16 %v370_v17, %v368_v16  ;;  %v2305_v21 = vpack.c.bf16 %v375_v19, %v373_v18  ;;  %v372_v22 = vld [vmem:[#allocation5 + $0x60] sm:$0xff]  ;;  %v374_v23 = vld [vmem:[#allocation5 + $0x70] sm:$0xff]  ;;  %v377_v24 = vld [vmem:[#allocation5 + $0x88] sm:$0xff]  ;;  %v394_v18 = vlaneseq  ;;  %p2920_p1 = pnand %p2919_p11, %p4733_p0  ;;  %s2922_s10 = sshll.u32 %s2999_s11, 4  ;;  %s2923_s10 = int_to_ptr.vmem [resolvable:$false] %s2922_s10 }
  0x72   : > { %v379_v25 = vld [vmem:[#allocation5 + $0x98] sm:$0xff]  ;;  %v2307_v26 = vpack.c.bf16 %v374_v23, %v372_v22  ;;  %v376_v28 = vld [vmem:[#allocation5 + $0x80] sm:$0xff]  ;;  %v378_v29 = vld [vmem:[#allocation5 + $0x90] sm:$0xff]  ;;  %s2924_s16 = scalar_lea.vmem %s2923_s10, 8192  ;;  %p2925_p5 = scmp.lt.s32.totalorder %s4533_s29, %s2923_s10 }
  0x73   : > { %v2309_v27 = vpack.c.bf16 %v379_v25, %v377_v24  ;;  %v381_v30 = vld [vmem:[#allocation5 + $0xa8] sm:$0xff]  ;;  %v383_v31 = vld [vmem:[#allocation5 + $0xb8] sm:$0xff]  ;;  %v2311_v32 = vpack.c.bf16 %v378_v29, %v376_v28  ;;  %v380_v34 = vld [vmem:[#allocation5 + $0xa0] sm:$0xff]  ;;  %v395_v19 = vshrl.u32 %v394_v18, 7  ;;  %p2921_p3 = pneg %p2920_p1  ;;  %p2926_p9 = scmp.lt.s32.totalorder %s2924_s16, %s2918_s23 }
  0x74   : > { %2300 = vmatpush1.bf16.msra.mxu0 %v2299_v14  ;;  %v2313_v33 = vpack.c.bf16 %v383_v31, %v381_v30  ;;  %v382_v35 = vld [vmem:[#allocation5 + $0xb0] sm:$0xff]  ;;  %v385_v36 = vld [vmem:[#allocation5 + $0xc8] sm:$0xff]  ;;  %v387_v37 = vld [vmem:[#allocation5 + $0xd8] sm:$0xff] }
  0x75   : > { %2302 = vmatprep.subr.bf16.mxu0 %v2301_v15  ;;  %v2315_v38 = vpack.c.bf16 %v382_v35, %v380_v34  ;;  %v2317_v39 = vpack.c.bf16 %v387_v37, %v385_v36  ;;  %v384_v40 = vld [vmem:[#allocation5 + $0xc0] sm:$0xff]  ;;  %v386_v41 = vld [vmem:[#allocation5 + $0xd0] sm:$0xff]  ;;  %v389_v42 = vld [vmem:[#allocation5 + $0xe8] sm:$0xff]  ;;  %v3305_v22 = vsub.s32 1, %v395_v19  ;;  %p2927_p12 = por %p2926_p9, %p2925_p5 }
  0x76   : > { %v391_v43 = vld [vmem:[#allocation5 + $0xf8] sm:$0xff]  ;;  %v2319_v44 = vpack.c.bf16 %v386_v41, %v384_v40  ;;  %v388_v46 = vld [vmem:[#allocation5 + $0xe0] sm:$0xff]  ;;  %v390_v47 = vld [vmem:[#allocation5 + $0xf0] sm:$0xff] }
  0x77   : > { %v2321_v45 = vpack.c.bf16 %v391_v43, %v389_v42  ;;  %v2323_v48 = vpack.c.bf16 %v390_v47, %v388_v46  ;;  %v328_v49 = vld [vmem:[%s3226_s15] sm:$0xff]  ;;  %v329_v50 = vld [vmem:[%s3226_s15 + $0x8] sm:$0xff]  ;;  %v330_v51 = vld [vmem:[%s3226_s15 + $0x10] sm:$0xff]  ;;  %4648 = vst [vmem:[#allocation13_spill] sm:$0xff] %v3305_v22  ;;  %p2928_p2 = pnand %p2927_p12, %p2921_p3 }
  0x78   : > { %2304 = vmatpush1.bf16.msra.mxu0 %v2303_v20  ;;  %v331_v52 = vld [vmem:[%s3226_s15 + $0x18] sm:$0xff]  ;;  %v332_v53 = vld [vmem:[%s3226_s15 + $0x20] sm:$0xff]  ;;  %v333_v54 = vld [vmem:[%s3226_s15 + $0x28] sm:$0xff]  ;;  %v3300_v20 = vsub.s32 0, %v395_v19 }
  0x79   : > { %2306 = vmatprep.subr.bf16.mxu0 %v2305_v21  ;;  %v334_v55 = vld [vmem:[%s3226_s15 + $0x30] sm:$0xff]  ;;  %v335_v56 = vld [vmem:[%s3226_s15 + $0x38] sm:$0xff]  ;;  %v336_v57 = vld [vmem:[%s3226_s15 + $0x40] sm:$0xff] }
  0x7a   : > { %v337_v58 = vld [vmem:[%s3226_s15 + $0x48] sm:$0xff]  ;;  %v338_v59 = vld [vmem:[%s3226_s15 + $0x50] sm:$0xff]  ;;  %v339_v60 = vld [vmem:[%s3226_s15 + $0x58] sm:$0xff]  ;;  %4647 = vst [vmem:[#allocation12_spill] sm:$0xff] %v3300_v20 }
  0x7b   : > { %v340_v61 = vld [vmem:[%s3226_s15 + $0x60] sm:$0xff]  ;;  %v341_v62 = vld [vmem:[%s3226_s15 + $0x68] sm:$0xff]  ;;  %v342_v63 = vld [vmem:[%s3226_s15 + $0x70] sm:$0xff] }
  0x7c   : > { %2308 = vmatpush1.bf16.msra.mxu0 %v2307_v26  ;;  %v343_v1 = vld [vmem:[%s3226_s15 + $0x78] sm:$0xff]  ;;  %v344_v2 = vld [vmem:[%s3226_s15 + $0x80] sm:$0xff]  ;;  %v345_v3 = vld [vmem:[%s3226_s15 + $0x88] sm:$0xff] }
  0x7d   : > { %2310 = vmatprep.subr.bf16.mxu0 %v2309_v27  ;;  %v346_v4 = vld [vmem:[%s3226_s15 + $0x90] sm:$0xff]  ;;  %v347_v5 = vld [vmem:[%s3226_s15 + $0x98] sm:$0xff]  ;;  %v348_v6 = vld [vmem:[%s3226_s15 + $0xa0] sm:$0xff] }
  0x7e   : > { %v349_v7 = vld [vmem:[%s3226_s15 + $0xa8] sm:$0xff]  ;;  %v350_v8 = vld [vmem:[%s3226_s15 + $0xb0] sm:$0xff]  ;;  %v351_v9 = vld [vmem:[%s3226_s15 + $0xb8] sm:$0xff] }
  0x7f   : > { %v352_v10 = vld [vmem:[%s3226_s15 + $0xc0] sm:$0xff]  ;;  %v353_v11 = vld [vmem:[%s3226_s15 + $0xc8] sm:$0xff]  ;;  %v354_v12 = vld [vmem:[%s3226_s15 + $0xd0] sm:$0xff] }
  0x80   : > { %2312 = vmatpush1.bf16.msra.mxu0 %v2311_v32  ;;  %v355_v13 = vld [vmem:[%s3226_s15 + $0xd8] sm:$0xff]  ;;  %v356_v14 = vld [vmem:[%s3226_s15 + $0xe0] sm:$0xff]  ;;  %v357_v15 = vld [vmem:[%s3226_s15 + $0xe8] sm:$0xff] }
  0x81   : > { %2314 = vmatprep.subr.bf16.mxu0 %v2313_v33  ;;  %v358_v16 = vld [vmem:[%s3226_s15 + $0xf0] sm:$0xff]  ;;  %v359_v17 = vld [vmem:[%s3226_s15 + $0xf8] sm:$0xff]  ;;  %v392_v21 = vld [vmem:[%s4581_s2] sm:$0x3] }
  0x82   : > { %v3308_v23 = vrot.slane %v392_v21, %v3300_v20  ;;  %v3311_v25 = vrot.slane %v392_v21, %v3305_v22 }
  0x84   : > { %2316 = vmatpush1.bf16.msra.mxu0 %v2315_v38 }
  0x85   : > { %2318 = vmatprep.subr.bf16.mxu0 %v2317_v39 }
  0x88   : > { %2320 = vmatpush1.bf16.msra.mxu0 %v2319_v44 }
  0x89   : > { %2322 = vmatprep.subr.bf16.mxu0 %v2321_v45 }
  0x8c   : > { %2324 = vmatpush1.bf16.msra.mxu0 %v2323_v48 }
  0x8f   : > { %469 = vmatmul.mubr.f32.vlgmr.msra.gmra.mrb[0].mxu0 %v328_v49 }
  0x90   : > { %474 = vmatprep.mubr.f32.mxu0 %v2997_v0 }
  0x93   : > { %475 = vmatmul.mubr.f32.gmra.mrb[2].mxu0 %v329_v50 }
  0x94   : > { %480 = vmatprep.mubr.f32.mxu0 %v2997_v0 }
  0x97   : > { %481 = vmatmul.mubr.f32.gmra.mrb[4].mxu0 %v330_v51 }
  0x98   : > { %486 = vmatprep.mubr.f32.mxu0 %v2997_v0 }
  0x9b   : > { %487 = vmatmul.mubr.f32.gmra.mrb[6].mxu0 %v331_v52 }
  0x9c   : > { %492 = vmatprep.mubr.f32.mxu0 %v2997_v0 }
  0x9f   : > { %493 = vmatmul.mubr.f32.gmra.mrb[8].mxu0 %v332_v53 }
  0xa0   : > { %498 = vmatprep.mubr.f32.mxu0 %v2997_v0 }
  0xa3   : > { %499 = vmatmul.mubr.f32.gmra.mrb[10].mxu0 %v333_v54 }
  0xa4   : > { %504 = vmatprep.mubr.f32.mxu0 %v2997_v0 }
  0xa7   : > { %505 = vmatmul.mubr.f32.gmra.mrb[12].mxu0 %v334_v55 }
  0xa8   : > { %510 = vmatprep.mubr.f32.mxu0 %v2997_v0 }
  0xab   : > { %511 = vmatmul.mubr.f32.gmra.mrb[14].mxu0 %v335_v56 }
  0xac   : > { %516 = vmatprep.mubr.f32.mxu0 %v2997_v0 }
  0xaf   : > { %517 = vmatmul.mubr.f32.gmra.mrb[16].mxu0 %v336_v57 }
  0xb0   : > { %522 = vmatprep.mubr.f32.mxu0 %v2997_v0 }
  0xb3   : > { %523 = vmatmul.mubr.f32.gmra.mrb[18].mxu0 %v337_v58 }
  0xb4   : > { %528 = vmatprep.mubr.f32.mxu0 %v2997_v0 }
  0xb7   : > { %529 = vmatmul.mubr.f32.gmra.mrb[20].mxu0 %v338_v59 }
  0xb8   : > { %534 = vmatprep.mubr.f32.mxu0 %v2997_v0 }
  0xbb   : > { %535 = vmatmul.mubr.f32.gmra.mrb[22].mxu0 %v339_v60 }
  0xbc   : > { %540 = vmatprep.mubr.f32.mxu0 %v2997_v0 }
  0xbf   : > { %541 = vmatmul.mubr.f32.gmra.mrb[24].mxu0 %v340_v61 }
  0xc0   : > { %546 = vmatprep.mubr.f32.mxu0 %v2997_v0 }
  0xc3   : > { %547 = vmatmul.mubr.f32.gmra.mrb[26].mxu0 %v341_v62 }
  0xc4   : > { %552 = vmatprep.mubr.f32.mxu0 %v2997_v0 }
  0xc7   : > { %553 = vmatmul.mubr.f32.gmra.mrb[28].mxu0 %v342_v63 }
  0xc8   : > { %558 = vmatprep.mubr.f32.mxu0 %v2997_v0 }
  0xcb   : > { %559 = vmatmul.mubr.f32.gmra.mrb[30].mxu0 %v343_v1 }
  0xcc   : > { %564 = vmatprep.mubr.f32.mxu0 %v2997_v0 }
  0xcf   : > { %565 = vmatmul.mubr.f32.gmra.mrb[32].mxu0 %v344_v2 }
  0xd0   : > { %570 = vmatprep.mubr.f32.mxu0 %v2997_v0 }
  0xd3   : > { %571 = vmatmul.mubr.f32.gmra.mrb[34].mxu0 %v345_v3 }
  0xd4   : > { %576 = vmatprep.mubr.f32.mxu0 %v2997_v0 }
  0xd7   : > { %577 = vmatmul.mubr.f32.gmra.mrb[36].mxu0 %v346_v4 }
  0xd8   : > { %582 = vmatprep.mubr.f32.mxu0 %v2997_v0 }
  0xdb   : > { %583 = vmatmul.mubr.f32.gmra.mrb[38].mxu0 %v347_v5 }
  0xdc   : > { %588 = vmatprep.mubr.f32.mxu0 %v2997_v0 }
  0xdf   : > { %589 = vmatmul.mubr.f32.gmra.mrb[40].mxu0 %v348_v6 }
  0xe0   : > { %594 = vmatprep.mubr.f32.mxu0 %v2997_v0 }
  0xe3   : > { %595 = vmatmul.mubr.f32.gmra.mrb[42].mxu0 %v349_v7 }
  0xe4   : > { %600 = vmatprep.mubr.f32.mxu0 %v2997_v0 }
  0xe7   : > { %601 = vmatmul.mubr.f32.gmra.mrb[44].mxu0 %v350_v8 }
  0xe8   : > { %606 = vmatprep.mubr.f32.mxu0 %v2997_v0 }
  0xeb   : > { %607 = vmatmul.mubr.f32.gmra.mrb[46].mxu0 %v351_v9 }
  0xec   : > { %612 = vmatprep.mubr.f32.mxu0 %v2997_v0 }
  0xef   : > { %613 = vmatmul.mubr.f32.gmra.mrb[48].mxu0 %v352_v10 }
  0xf0   : > { %618 = vmatprep.mubr.f32.mxu0 %v2997_v0 }
  0xf3   : > { %619 = vmatmul.mubr.f32.gmra.mrb[50].mxu0 %v353_v11 }
  0xf4   : > { %624 = vmatprep.mubr.f32.mxu0 %v2997_v0 }
  0xf7   : > { %625 = vmatmul.mubr.f32.gmra.mrb[52].mxu0 %v354_v12 }
  0xf8   : > { %630 = vmatprep.mubr.f32.mxu0 %v2997_v0 }
  0xfb   : > { %631 = vmatmul.mubr.f32.gmra.mrb[54].mxu0 %v355_v13 }
  0xfc   : > { %636 = vmatprep.mubr.f32.mxu0 %v2997_v0 }
  0xff   : > { %637 = vmatmul.mubr.f32.gmra.mrb[56].mxu0 %v356_v14 }
 0x100   : > { %642 = vmatprep.mubr.f32.mxu0 %v2997_v0 }
 0x103   : > { %643 = vmatmul.mubr.f32.gmra.mrb[58].mxu0 %v357_v15 }
 0x104   : > { %648 = vmatprep.mubr.f32.mxu0 %v2997_v0 }
 0x107   : > { %649 = vmatmul.mubr.f32.gmra.mrb[60].mxu0 %v358_v16 }
 0x108   : > { %654 = vmatprep.mubr.f32.mxu0 %v2997_v0 }
 0x10b   : > { %655 = vmatmul.mubr.f32.gmra.mrb[62].mxu0 %v359_v17 }
 0x162   : > { %v470_v24 = vpop.f32.mrb[0].mxu0 }
 0x163   : > { %v472_v0 = vpop.f32.mrb[1].mxu0  ;;  %v3314_v26 = vadd.f32 %v470_v24, %v3308_v23 }
 0x164   : > { %v3317_v28 = vadd.f32 %v472_v0, %v3311_v25 }
 0x165   : > { %v2221_v30 = vmul.f32 -1.442695, %v3314_v26 }
 0x166   : > { %v476_v27 = vpop.f32.mrb[2].mxu0  ;;  %v2222_v34 = vmul.f32 -1.442695, %v3317_v28 }
 0x167   : > { %v478_v29 = vpop.f32.mrb[3].mxu0  ;;  %v3321_v31 = vadd.f32 %v476_v27, %v3308_v23  ;;  %2480 = vpow2.f32 %v2221_v30 }
 0x168   : > { %v3324_v32 = vadd.f32 %v478_v29, %v3311_v25  ;;  %2482 = vpow2.f32 %v2222_v34 }
 0x169   : > { %v2223_v36 = vmul.f32 -1.442695, %v3321_v31 }
 0x16a   : > { %v3326_v33 = vpop.f32.mrb[4].mxu0  ;;  %v2224_v37 = vmul.f32 -1.442695, %v3324_v32 }
 0x16b   : > { %v3329_v35 = vpop.f32.mrb[5].mxu0  ;;  %2484 = vpow2.f32 %v2223_v36 }
 0x16c   : > { %2486 = vpow2.f32 %v2224_v37 }
 0x16e   : > { %v3333_v38 = vpop.f32.mrb[6].mxu0 }
 0x16f   : > { %v3335_v39 = vpop.f32.mrb[7].mxu0 }
 0x171   : > { %v2481_v45 = vpop.eup %2480 }
 0x172   : > { %v494_v40 = vpop.f32.mrb[8].mxu0  ;;  %v2483_v51 = vpop.eup %2482  ;;  %v853_v52 = vadd.f32 1.0, %v2481_v45 }
 0x173   : > { %v3338_v41 = vadd.f32 %v494_v40, %v3308_v23  ;;  %v496_v42 = vpop.f32.mrb[9].mxu0  ;;  %v854_v60 = vadd.f32 1.0, %v2483_v51 }
 0x174   : > { %v3341_v43 = vadd.f32 %v496_v42, %v3311_v25 }
 0x175   : > { %v2229_v44 = vmul.f32 -1.442695, %v3338_v41  ;;  %v2485_v56 = vpop.eup %2484 }
 0x176   : > { %v2230_v46 = vmul.f32 -1.442695, %v3341_v43  ;;  %v500_v47 = vpop.f32.mrb[10].mxu0  ;;  %v2487_v59 = vpop.eup %2486  ;;  %v855_v63 = vadd.f32 1.0, %v2485_v56 }
 0x177   : > { %2488 = vpow2.f32 %v2229_v44  ;;  %v3346_v48 = vadd.f32 %v500_v47, %v3308_v23  ;;  %v502_v49 = vpop.f32.mrb[11].mxu0  ;;  %v856_v3 = vadd.f32 1.0, %v2487_v59 }
 0x178   : > { %v3349_v50 = vadd.f32 %v502_v49, %v3311_v25  ;;  %2490 = vpow2.f32 %v2230_v46 }
 0x179   : > { %v2231_v53 = vmul.f32 -1.442695, %v3346_v48 }
 0x17a   : > { %v2232_v54 = vmul.f32 -1.442695, %v3349_v50  ;;  %v506_v55 = vpop.f32.mrb[12].mxu0 }
 0x17b   : > { %2492 = vpow2.f32 %v2231_v53  ;;  %v3354_v57 = vadd.f32 %v506_v55, %v3308_v23  ;;  %v508_v58 = vpop.f32.mrb[13].mxu0 }
 0x17c   : > { %v3357_v61 = vadd.f32 %v508_v58, %v3311_v25  ;;  %2494 = vrcp.f32 %v853_v52 }
 0x17d   : > { %v2233_v62 = vmul.f32 -1.442695, %v3354_v57  ;;  %2496 = vpow2.f32 %v2232_v54 }
 0x17e   : > { %v2234_v1 = vmul.f32 -1.442695, %v3357_v61  ;;  %v512_v2 = vpop.f32.mrb[14].mxu0 }
 0x17f   : > { %2498 = vpow2.f32 %v2233_v62  ;;  %v3362_v4 = vadd.f32 %v512_v2, %v3308_v23  ;;  %v514_v5 = vpop.f32.mrb[15].mxu0 }
 0x180   : > { %2500 = vrcp.f32 %v854_v60  ;;  %v3365_v6 = vadd.f32 %v514_v5, %v3311_v25 }
 0x181   : > { %v2489_v7 = vpop.eup %2488  ;;  %2502 = vpow2.f32 %v2234_v1  ;;  %v2235_v8 = vmul.f32 -1.442695, %v3362_v4 }
 0x182   : > { %2504 = vrcp.f32 %v855_v63  ;;  %v861_v9 = vadd.f32 1.0, %v2489_v7  ;;  %v2236_v10 = vmul.f32 -1.442695, %v3365_v6  ;;  %v518_v11 = vpop.f32.mrb[16].mxu0  ;;  %v2491_v14 = vpop.eup %2490 }
 0x183   : > { %2506 = vrcp.f32 %v856_v3  ;;  %v3370_v12 = vadd.f32 %v518_v11, %v3308_v23  ;;  %v520_v13 = vpop.f32.mrb[17].mxu0  ;;  %v862_v17 = vadd.f32 1.0, %v2491_v14 }
 0x184   : > { %2508 = vrcp.f32 %v861_v9  ;;  %v3373_v15 = vadd.f32 %v520_v13, %v3311_v25 }
 0x185   : > { %v2493_v16 = vpop.eup %2492  ;;  %2510 = vpow2.f32 %v2235_v8  ;;  %v2237_v18 = vmul.f32 -1.442695, %v3370_v12 }
 0x186   : > { %v863_v19 = vadd.f32 1.0, %v2493_v16  ;;  %2512 = vpow2.f32 %v2236_v10  ;;  %v2238_v21 = vmul.f32 -1.442695, %v3373_v15  ;;  %v524_v24 = vpop.f32.mrb[18].mxu0  ;;  %v3377_v0 = vpop.eup %2494 }
 0x187   : > { %2514 = vrcp.f32 %v862_v17  ;;  %v3380_v27 = vadd.f32 %v524_v24, %v3308_v23  ;;  %v526_v29 = vpop.f32.mrb[19].mxu0  ;;  %v2497_v30 = vpop.eup %2496 }
 0x188   : > { %2516 = vrcp.f32 %v863_v19  ;;  %v3383_v34 = vadd.f32 %v526_v29, %v3311_v25  ;;  %v864_v37 = vadd.f32 1.0, %v2497_v30 }
 0x189   : > { %v2499_v36 = vpop.eup %2498  ;;  %2518 = vpow2.f32 %v2237_v18  ;;  %v2239_v40 = vmul.f32 -1.442695, %v3380_v27 }
 0x18a   : > { %v3386_v42 = vpop.eup %2500  ;;  %v865_v44 = vadd.f32 1.0, %v2499_v36  ;;  %2520 = vpow2.f32 %v2238_v21  ;;  %v530_v45 = vpop.f32.mrb[20].mxu0  ;;  %v2240_v47 = vmul.f32 -1.442695, %v3383_v34 }
 0x18b   : > { %v2503_v46 = vpop.eup %2502  ;;  %2522 = vrcp.f32 %v864_v37  ;;  %v3390_v49 = vadd.f32 %v530_v45, %v3308_v23  ;;  %v532_v51 = vpop.f32.mrb[21].mxu0 }
 0x18c   : > { %v3392_v52 = vpop.eup %2504  ;;  %2524 = vrcp.f32 %v865_v44  ;;  %v866_v53 = vadd.f32 1.0, %v2503_v46  ;;  %v3395_v54 = vadd.f32 %v532_v51, %v3311_v25 }
 0x18d   : > { %v3397_v55 = vpop.eup %2506  ;;  %2526 = vpow2.f32 %v2239_v40  ;;  %v2241_v56 = vmul.f32 -1.442695, %v3390_v49 }
 0x18e   : > { %v2509_v58 = vpop.eup %2508  ;;  %2528 = vrcp.f32 %v866_v53  ;;  %v2242_v59 = vmul.f32 -1.442695, %v3395_v54  ;;  %v536_v60 = vpop.f32.mrb[22].mxu0 }
 0x18f   : > { %v2511_v62 = vpop.eup %2510  ;;  %2530 = vpow2.f32 %v2240_v47  ;;  %v3402_v63 = vadd.f32 %v536_v60, %v3308_v23  ;;  %v538_v1 = vpop.f32.mrb[23].mxu0  ;;  %v3408_v7 = vmul.f32 %v2509_v58, %v3338_v41 }
 0x190   : > { %v2513_v2 = vpop.eup %2512  ;;  %v867_v3 = vadd.f32 1.0, %v2511_v62  ;;  %2532 = vpow2.f32 %v2241_v56  ;;  %v3405_v5 = vadd.f32 %v538_v1, %v3311_v25 }
 0x191   : > { %v2515_v8 = vpop.eup %2514  ;;  %v868_v9 = vadd.f32 1.0, %v2513_v2  ;;  %2534 = vpow2.f32 %v2242_v59  ;;  %v2243_v10 = vmul.f32 -1.442695, %v3402_v63 }
 0x192   : > { %v2517_v11 = vpop.eup %2516  ;;  %2536 = vrcp.f32 %v867_v3  ;;  %v2244_v13 = vmul.f32 -1.442695, %v3405_v5  ;;  %v542_v14 = vpop.f32.mrb[24].mxu0  ;;  %v3413_v16 = vmul.f32 %v2515_v8, %v3341_v43 }
 0x193   : > { %v2519_v17 = vpop.eup %2518  ;;  %v3416_v18 = vmul.f32 %v2517_v11, %v3346_v48  ;;  %2538 = vrcp.f32 %v868_v9  ;;  %v3419_v41 = vadd.f32 %v542_v14, %v3308_v23  ;;  %v544_v19 = vpop.f32.mrb[25].mxu0 }
 0x194   : > { %v2521_v21 = vpop.eup %2520  ;;  %v869_v24 = vadd.f32 1.0, %v2519_v17  ;;  %2540 = vpow2.f32 %v2243_v10  ;;  %v3422_v29 = vadd.f32 %v544_v19, %v3311_v25  ;;  %v1121_v30 = vadd.f32 %v3413_v16, %v3408_v7 }
 0x195   : > { %v2523_v43 = vpop.eup %2522  ;;  %v870_v36 = vadd.f32 1.0, %v2521_v21  ;;  %2542 = vpow2.f32 %v2244_v13  ;;  %v2245_v48 = vmul.f32 -1.442695, %v3419_v41 }
 0x196   : > { %v2525_v37 = vpop.eup %2524  ;;  %v3428_v40 = vmul.f32 %v2523_v43, %v3349_v50  ;;  %2544 = vrcp.f32 %v869_v24  ;;  %v2246_v44 = vmul.f32 -1.442695, %v3422_v29  ;;  %1122 = vadd.xlane.f32.xlu0 %v1121_v30  ;;  %v548_v45 = vpop.f32.mrb[26].mxu0 }
 0x197   : > { %v2527_v46 = vpop.eup %2526  ;;  %2546 = vrcp.f32 %v870_v36  ;;  %v3432_v47 = vadd.f32 %v548_v45, %v3308_v23  ;;  %v550_v51 = vpop.f32.mrb[27].mxu0  ;;  %v3435_v53 = vmul.f32 %v2525_v37, %v3354_v57 }
 0x198   : > { %v2529_v56 = vpop.eup %2528  ;;  %v871_v58 = vadd.f32 1.0, %v2527_v46  ;;  %2548 = vpow2.f32 %v2245_v48  ;;  %v3438_v50 = vadd.f32 %v550_v51, %v3311_v25  ;;  %v1124_v59 = vadd.f32 %v3428_v40, %v3416_v18 }
 0x199   : > { %v2531_v60 = vpop.eup %2530  ;;  %2550 = vpow2.f32 %v2246_v44  ;;  %v2247_v62 = vmul.f32 -1.442695, %v3432_v47  ;;  %v3444_v1 = vmul.f32 %v2529_v56, %v3357_v61 }
 0x19a   : > { %v2533_v2 = vpop.eup %2532  ;;  %2552 = vrcp.f32 %v871_v58  ;;  %v872_v57 = vadd.f32 1.0, %v2531_v60  ;;  %v2248_v3 = vmul.f32 -1.442695, %v3438_v50  ;;  %1125 = vadd.xlane.f32.xlu0 %v1124_v59  ;;  %v554_v8 = vpop.f32.mrb[28].mxu0 }
 0x19b   : > { %v2535_v9 = vpop.eup %2534  ;;  %v873_v10 = vadd.f32 1.0, %v2533_v2  ;;  %2554 = vpow2.f32 %v2247_v62  ;;  %v3448_v11 = vadd.f32 %v554_v8, %v3308_v23  ;;  %v556_v13 = vpop.f32.mrb[29].mxu0  ;;  %v1127_v14 = vadd.f32 %v3444_v1, %v3435_v53 }
 0x19c   : > { %v2537_v17 = vpop.eup %2536  ;;  %2556 = vrcp.f32 %v872_v57  ;;  %v874_v61 = vadd.f32 1.0, %v2535_v9  ;;  %v3453_v19 = vadd.f32 %v556_v13, %v3311_v25 }
 0x19d   : > { %v2539_v21 = vpop.eup %2538  ;;  %v3456_v24 = vmul.f32 %v2537_v17, %v3362_v4  ;;  %2558 = vrcp.f32 %v873_v10  ;;  %v2249_v30 = vmul.f32 -1.442695, %v3448_v11  ;;  %1128 = vadd.xlane.f32.xlu1 %v1127_v14 }
 0x19e   : > { %v2541_v43 = vpop.eup %2540  ;;  %v3460_v36 = vmul.f32 %v2539_v21, %v3365_v6  ;;  %2560 = vrcp.f32 %v874_v61  ;;  %v560_v48 = vpop.f32.mrb[30].mxu0  ;;  %v2250_v45 = vmul.f32 -1.442695, %v3453_v19 }
 0x19f   : > { %v2543_v37 = vpop.eup %2542  ;;  %v875_v44 = vadd.f32 1.0, %v2541_v43  ;;  %2562 = vpow2.f32 %v2248_v3  ;;  %v3464_v46 = vadd.f32 %v560_v48, %v3308_v23  ;;  %v562_v4 = vpop.f32.mrb[31].mxu0 }
 0x1a0   : > { %v2545_v51 = vpop.eup %2544  ;;  %v876_v56 = vadd.f32 1.0, %v2543_v37  ;;  %2564 = vpow2.f32 %v2249_v30  ;;  %v3467_v58 = vadd.f32 %v562_v4, %v3311_v25  ;;  %v1130_v6 = vadd.f32 %v3460_v36, %v3456_v24 }
 0x1a1   : > { %v2547_v59 = vpop.eup %2546  ;;  %v3472_v60 = vmul.f32 %v2545_v51, %v3370_v12  ;;  %2566 = vrcp.f32 %v875_v44  ;;  %v2251_v62 = vmul.f32 -1.442695, %v3464_v46 }
 0x1a2   : > { %v2549_v2 = vpop.eup %2548  ;;  %v3476_v57 = vmul.f32 %v2547_v59, %v3373_v15  ;;  %2568 = vrcp.f32 %v876_v56  ;;  %1131 = vadd.xlane.f32.xlu1 %v1130_v6  ;;  %v566_v3 = vpop.f32.mrb[32].mxu0  ;;  %v2252_v10 = vmul.f32 -1.442695, %v3467_v58 }
 0x1a3   : > { %v2551_v8 = vpop.eup %2550  ;;  %v877_v9 = vadd.f32 1.0, %v2549_v2  ;;  %2570 = vpow2.f32 %v2250_v45  ;;  %v3480_v13 = vadd.f32 %v566_v3, %v3308_v23  ;;  %v568_v12 = vpop.f32.mrb[33].mxu0 }
 0x1a4   : > { %v2553_v14 = vpop.eup %2552  ;;  %v878_v17 = vadd.f32 1.0, %v2551_v8  ;;  %2572 = vpow2.f32 %v2251_v62  ;;  %v3483_v61 = vadd.f32 %v568_v12, %v3311_v25  ;;  %v1133_v15 = vadd.f32 %v3476_v57, %v3472_v60 }
 0x1a5   : > { %v2555_v21 = vpop.eup %2554  ;;  %v3488_v30 = vmul.f32 %v2553_v14, %v3380_v27  ;;  %2574 = vrcp.f32 %v877_v9  ;;  %v2253_v43 = vmul.f32 -1.442695, %v3480_v13 }
 0x1a6   : > { %v2557_v48 = vpop.eup %2556  ;;  %2576 = vrcp.f32 %v878_v17  ;;  %v879_v37 = vadd.f32 1.0, %v2555_v21  ;;  %v2254_v44 = vmul.f32 -1.442695, %v3483_v61  ;;  %1134 = vadd.xlane.f32.xlu0 %v1133_v15  ;;  %v572_v45 = vpop.f32.mrb[34].mxu0 }
 0x1a7   : > { %v2559_v4 = vpop.eup %2558  ;;  %v3493_v51 = vmul.f32 %v2557_v48, %v3383_v34  ;;  %2578 = vpow2.f32 %v2252_v10  ;;  %v3496_v56 = vadd.f32 %v572_v45, %v3308_v23  ;;  %v574_v27 = vpop.f32.mrb[35].mxu0 }
 0x1a8   : > { %v2561_v6 = vpop.eup %2560  ;;  %v3499_v59 = vmul.f32 %v2559_v4, %v3390_v49  ;;  %2580 = vrcp.f32 %v879_v37  ;;  %v3502_v62 = vadd.f32 %v574_v27, %v3311_v25 }
 0x1a9   : > { %v2563_v2 = vpop.eup %2562  ;;  %v3505_v3 = vmul.f32 %v2561_v6, %v3395_v54  ;;  %2582 = vpow2.f32 %v2253_v43  ;;  %v2255_v34 = vmul.f32 -1.442695, %v3496_v56  ;;  %v1136_v8 = vadd.f32 %v3493_v51, %v3488_v30 }
 0x1aa   : > { %v2565_v9 = vpop.eup %2564  ;;  %v880_v10 = vadd.f32 1.0, %v2563_v2  ;;  %2584 = vpow2.f32 %v2254_v44  ;;  %v2256_v49 = vmul.f32 -1.442695, %v3502_v62  ;;  %v578_v12 = vpop.f32.mrb[36].mxu0 }
 0x1ab   : > { %v2567_v14 = vpop.eup %2566  ;;  %v881_v17 = vadd.f32 1.0, %v2565_v9  ;;  %2586 = vpow2.f32 %v2255_v34  ;;  %1137 = vadd.xlane.f32.xlu1 %v1136_v8  ;;  %v3512_v15 = vadd.f32 %v578_v12, %v3308_v23  ;;  %v580_v54 = vpop.f32.mrb[37].mxu0  ;;  %v1139_v21 = vadd.f32 %v3505_v3, %v3499_v59 }
 0x1ac   : > { %v2569_v43 = vpop.eup %2568  ;;  %v3517_v48 = vmul.f32 %v2567_v14, %v3402_v63  ;;  %2588 = vrcp.f32 %v880_v10  ;;  %v3520_v37 = vadd.f32 %v580_v54, %v3311_v25 }
 0x1ad   : > { %v2571_v44 = vpop.eup %2570  ;;  %v3523_v45 = vmul.f32 %v2569_v43, %v3405_v5  ;;  %2590 = vrcp.f32 %v881_v17  ;;  %v2257_v4 = vmul.f32 -1.442695, %v3512_v15  ;;  %1140 = vadd.xlane.f32.xlu0 %v1139_v21 }
 0x1ae   : > { %v2573_v27 = vpop.eup %2572  ;;  %v882_v6 = vadd.f32 1.0, %v2571_v44  ;;  %2592 = vpow2.f32 %v2256_v49  ;;  %v2258_v2 = vmul.f32 -1.442695, %v3520_v37  ;;  %v584_v34 = vpop.f32.mrb[38].mxu0 }
 0x1af   : > { %v2575_v63 = vpop.eup %2574  ;;  %v883_v8 = vadd.f32 1.0, %v2573_v27  ;;  %2594 = vpow2.f32 %v2257_v4  ;;  %v3528_v9 = vadd.f32 %v584_v34, %v3308_v23  ;;  %v586_v10 = vpop.f32.mrb[39].mxu0  ;;  %v1142_v5 = vadd.f32 %v3523_v45, %v3517_v48 }
 0x1b0   : > { %v2577_v12 = vpop.eup %2576  ;;  %v3533_v14 = vmul.f32 %v2575_v63, %v3419_v41  ;;  %2596 = vrcp.f32 %v882_v6  ;;  %v3536_v49 = vadd.f32 %v586_v10, %v3311_v25 }
 0x1b1   : > { %v2579_v17 = vpop.eup %2578  ;;  %v3539_v54 = vmul.f32 %v2577_v12, %v3422_v29  ;;  %2598 = vrcp.f32 %v883_v8  ;;  %v2259_v21 = vmul.f32 -1.442695, %v3528_v9  ;;  %1143 = vadd.xlane.f32.xlu1 %v1142_v5 }
 0x1b2   : > { %v2581_v43 = vpop.eup %2580  ;;  %v884_v44 = vadd.f32 1.0, %v2579_v17  ;;  %2600 = vpow2.f32 %v2258_v2  ;;  %v2260_v4 = vmul.f32 -1.442695, %v3536_v49  ;;  %v590_v27 = vpop.f32.mrb[40].mxu0 }
 0x1b3   : > { %4649 = vst [vmem:[#allocation14_spill] sm:$0xff] %v3539_v54  ;;  %v2583_v41 = vpop.eup %2582  ;;  %2602 = vpow2.f32 %v2259_v21  ;;  %v3544_v6 = vadd.f32 %v590_v27, %v3308_v23  ;;  %v592_v34 = vpop.f32.mrb[41].mxu0  ;;  %v1145_v29 = vadd.f32 %v3539_v54, %v3533_v14  ;;  %v3552_v2 = vmul.f32 %v2581_v43, %v3432_v47 }
 0x1b4   : > { %v2585_v63 = vpop.eup %2584  ;;  %2604 = vrcp.f32 %v884_v44  ;;  %v885_v8 = vadd.f32 1.0, %v2583_v41  ;;  %v3549_v10 = vadd.f32 %v592_v34, %v3311_v25 }
 0x1b5   : > { %v2587_v5 = vpop.eup %2586  ;;  %4650 = vst [vmem:[#allocation15_spill] sm:$0xff] %v3552_v2  ;;  %v886_v12 = vadd.f32 1.0, %v2585_v63  ;;  %2606 = vpow2.f32 %v2260_v4  ;;  %v2261_v17 = vmul.f32 -1.442695, %v3544_v6  ;;  %1146 = vadd.xlane.f32.xlu0 %v1145_v29 }
 0x1b6   : > { %v2589_v21 = vpop.eup %2588  ;;  %2608 = vrcp.f32 %v885_v8  ;;  %v887_v27 = vadd.f32 1.0, %v2587_v5  ;;  %v2262_v22 = vmul.f32 -1.442695, %v3549_v10  ;;  %v596_v20 = vpop.f32.mrb[42].mxu0 }
 0x1b7   : > { %v2591_v44 = vpop.eup %2590  ;;  %v3557_v41 = vmul.f32 %v2589_v21, %v3438_v50  ;;  %2610 = vrcp.f32 %v886_v12  ;;  %v3560_v34 = vadd.f32 %v596_v20, %v3308_v23  ;;  %v598_v47 = vpop.f32.mrb[43].mxu0 }
 0x1b8   : > { %v2593_v43 = vpop.eup %2592  ;;  %v3563_v4 = vmul.f32 %v2591_v44, %v3448_v11  ;;  %2612 = vrcp.f32 %v887_v27  ;;  %v3566_v29 = vadd.f32 %v598_v47, %v3311_v25 }
 0x1b9   : > { %4651 = vst [vmem:[#allocation16_spill] sm:$0xff] %v3557_v41  ;;  %v2595_v63 = vpop.eup %2594  ;;  %v888_v8 = vadd.f32 1.0, %v2593_v43  ;;  %2614 = vpow2.f32 %v2261_v17  ;;  %v2263_v5 = vmul.f32 -1.442695, %v3560_v34  ;;  %v1148_v50 = vadd.f32 %v3557_v41, %v3552_v2 }
 0x1ba   : > { %v2597_v12 = vpop.eup %2596  ;;  %v889_v20 = vadd.f32 1.0, %v2595_v63  ;;  %2616 = vpow2.f32 %v2262_v22  ;;  %v2264_v21 = vmul.f32 -1.442695, %v3566_v29  ;;  %v602_v54 = vpop.f32.mrb[44].mxu0 }
 0x1bb   : > { %v2599_v11 = vpop.eup %2598  ;;  %v3573_v27 = vmul.f32 %v2597_v12, %v3453_v19  ;;  %2618 = vrcp.f32 %v888_v8  ;;  %1149 = vadd.xlane.f32.xlu1 %v1148_v50  ;;  %v3576_v44 = vadd.f32 %v602_v54, %v3308_v23  ;;  %v604_v17 = vpop.f32.mrb[45].mxu0 }
 0x1bc   : > { %v2601_v47 = vpop.eup %2600  ;;  %v3579_v43 = vmul.f32 %v2599_v11, %v3464_v46  ;;  %2620 = vrcp.f32 %v889_v20  ;;  %v3582_v22 = vadd.f32 %v604_v17, %v3311_v25 }
 0x1bd   : > { %4652 = vst [vmem:[#allocation17_spill] sm:$0xff] %v3573_v27  ;;  %v2603_v63 = vpop.eup %2602  ;;  %v890_v41 = vadd.f32 1.0, %v2601_v47  ;;  %2622 = vpow2.f32 %v2263_v5  ;;  %v2265_v19 = vmul.f32 -1.442695, %v3576_v44  ;;  %v1151_v8 = vadd.f32 %v3573_v27, %v3563_v4 }
 0x1be   : > { %4653 = vst [vmem:[#allocation18_spill] sm:$0xff] %v3579_v43  ;;  %v2605_v50 = vpop.eup %2604  ;;  %v891_v54 = vadd.f32 1.0, %v2603_v63  ;;  %2624 = vpow2.f32 %v2264_v21  ;;  %v608_v12 = vpop.f32.mrb[46].mxu0  ;;  %v2266_v20 = vmul.f32 -1.442695, %v3582_v22 }
 0x1bf   : > { %v2607_v2 = vpop.eup %2606  ;;  %v3588_v46 = vmul.f32 %v2605_v50, %v3467_v58  ;;  %2626 = vrcp.f32 %v890_v41  ;;  %1152 = vadd.xlane.f32.xlu0 %v1151_v8  ;;  %v3592_v11 = vadd.f32 %v608_v12, %v3308_v23  ;;  %v610_v5 = vpop.f32.mrb[47].mxu0 }
 0x1c0   : > { %v2609_v17 = vpop.eup %2608  ;;  %2628 = vrcp.f32 %v891_v54  ;;  %v892_v47 = vadd.f32 1.0, %v2607_v2  ;;  %v3595_v27 = vadd.f32 %v610_v5, %v3311_v25 }
 0x1c1   : > { %4654 = vst [vmem:[#allocation19_spill] sm:$0xff] %v3588_v46  ;;  %v2611_v21 = vpop.eup %2610  ;;  %v3598_v63 = vmul.f32 %v2609_v17, %v3480_v13  ;;  %2630 = vpow2.f32 %v2265_v19  ;;  %v2267_v58 = vmul.f32 -1.442695, %v3592_v11  ;;  %v1154_v41 = vadd.f32 %v3588_v46, %v3579_v43 }
 0x1c2   : > { %v2613_v8 = vpop.eup %2612  ;;  %v3604_v50 = vmul.f32 %v2611_v21, %v3483_v61  ;;  %2632 = vrcp.f32 %v892_v47  ;;  %v2268_v2 = vmul.f32 -1.442695, %v3595_v27  ;;  %v614_v54 = vpop.f32.mrb[48].mxu0 }
 0x1c3   : > { %v2615_v12 = vpop.eup %2614  ;;  %v3608_v5 = vmul.f32 %v2613_v8, %v3496_v56  ;;  %2634 = vpow2.f32 %v2266_v20  ;;  %1155 = vadd.xlane.f32.xlu1 %v1154_v41  ;;  %v3611_v13 = vadd.f32 %v614_v54, %v3308_v23  ;;  %v616_v19 = vpop.f32.mrb[49].mxu0 }
 0x1c4   : > { %4655 = vst [vmem:[#allocation20_spill] sm:$0xff] %v3604_v50  ;;  %v2617_v17 = vpop.eup %2616  ;;  %v893_v46 = vadd.f32 1.0, %v2615_v12  ;;  %2636 = vpow2.f32 %v2267_v58  ;;  %v3614_v61 = vadd.f32 %v616_v19, %v3311_v25  ;;  %v1157_v47 = vadd.f32 %v3604_v50, %v3598_v63 }
 0x1c5   : > { %4656 = vst [vmem:[#allocation21_spill] sm:$0xff] %v3608_v5  ;;  %v2619_v21 = vpop.eup %2618  ;;  %v894_v43 = vadd.f32 1.0, %v2617_v17  ;;  %2638 = vpow2.f32 %v2268_v2  ;;  %v2269_v56 = vmul.f32 -1.442695, %v3611_v13 }
 0x1c6   : > { %v2621_v20 = vpop.eup %2620  ;;  %v3620_v41 = vmul.f32 %v2619_v21, %v3502_v62  ;;  %2640 = vrcp.f32 %v893_v46  ;;  %v2270_v8 = vmul.f32 -1.442695, %v3614_v61  ;;  %1158 = vadd.xlane.f32.xlu0 %v1157_v47  ;;  %v620_v58 = vpop.f32.mrb[50].mxu0 }
 0x1c7   : > { %v2623_v54 = vpop.eup %2622  ;;  %v3624_v12 = vmul.f32 %v2621_v20, %v3512_v15  ;;  %2642 = vrcp.f32 %v894_v43  ;;  %v3627_v19 = vadd.f32 %v620_v58, %v3308_v23  ;;  %v622_v2 = vpop.f32.mrb[51].mxu0 }
 0x1c8   : > { %4657 = vst [vmem:[#allocation22_spill] sm:$0xff] %v3620_v41  ;;  %v2625_v17 = vpop.eup %2624  ;;  %v895_v50 = vadd.f32 1.0, %v2623_v54  ;;  %2644 = vpow2.f32 %v2269_v56  ;;  %v3630_v62 = vadd.f32 %v622_v2, %v3311_v25  ;;  %v1160_v46 = vadd.f32 %v3620_v41, %v3608_v5 }
 0x1c9   : > { %v2627_v47 = vpop.eup %2626  ;;  %v896_v21 = vadd.f32 1.0, %v2625_v17  ;;  %2646 = vpow2.f32 %v2270_v8  ;;  %v2271_v15 = vmul.f32 -1.442695, %v3627_v19 }
 0x1ca   : > { %v2629_v20 = vpop.eup %2628  ;;  %v3636_v43 = vmul.f32 %v2627_v47, %v3520_v37  ;;  %2648 = vrcp.f32 %v895_v50  ;;  %v2272_v58 = vmul.f32 -1.442695, %v3630_v62  ;;  %1161 = vadd.xlane.f32.xlu1 %v1160_v46  ;;  %v626_v56 = vpop.f32.mrb[52].mxu0  ;;  %v3652_v47 = vmul.f32 %v3392_v52, %v3321_v31 }
 0x1cb   : > { %v2631_v54 = vpop.eup %2630  ;;  %v3640_v2 = vmul.f32 %v2629_v20, %v3528_v9  ;;  %2650 = vrcp.f32 %v896_v21  ;;  %v3643_v41 = vadd.f32 %v626_v56, %v3308_v23  ;;  %v628_v8 = vpop.f32.mrb[53].mxu0 }
 0x1cc   : > { %4658 = vst [vmem:[#allocation23_spill] sm:$0xff] %v3636_v43  ;;  %v2633_v17 = vpop.eup %2632  ;;  %v897_v5 = vadd.f32 1.0, %v2631_v54  ;;  %2652 = vpow2.f32 %v2271_v15  ;;  %v3646_v37 = vadd.f32 %v628_v8, %v3311_v25  ;;  %v1163_v50 = vadd.f32 %v3636_v43, %v3624_v12  ;;  %4659 = vst [vmem:[#allocation24_spill] sm:$0xff] %v3652_v47 }
 0x1cd   : > { %v2635_v46 = vpop.eup %2634  ;;  %v3655_v9 = vmul.f32 %v2633_v17, %v3536_v49  ;;  %2654 = vpow2.f32 %v2272_v58  ;;  %v2273_v21 = vmul.f32 -1.442695, %v3643_v41  ;;  %v3660_v15 = vmul.f32 %v3397_v55, %v3324_v32 }
 0x1ce   : > { %v2637_v20 = vpop.eup %2636  ;;  %2656 = vrcp.f32 %v897_v5  ;;  %v898_v56 = vadd.f32 1.0, %v2635_v46  ;;  %v2274_v54 = vmul.f32 -1.442695, %v3646_v37  ;;  %1164 = vadd.xlane.f32.xlu0 %v1163_v50  ;;  %v632_v8 = vpop.f32.mrb[54].mxu0  ;;  %v3673_v50 = vmul.f32 %v3377_v0, %v3314_v26 }
 0x1cf   : > { %4660 = vst [vmem:[#allocation25_spill] sm:$0xff] %v3660_v15  ;;  %v2639_v43 = vpop.eup %2638  ;;  %v899_v31 = vadd.f32 1.0, %v2637_v20  ;;  %2658 = vpow2.f32 %v2273_v21  ;;  %v3664_v52 = vadd.f32 %v632_v8, %v3308_v23  ;;  %v634_v49 = vpop.f32.mrb[55].mxu0  ;;  %v1166_v58 = vadd.f32 %v3655_v9, %v3640_v2 }
 0x1d0   : > { %v2641_v17 = vpop.eup %2640  ;;  %2660 = vrcp.f32 %v898_v56  ;;  %v900_v32 = vadd.f32 1.0, %v2639_v43  ;;  %v3669_v55 = vadd.f32 %v634_v49, %v3311_v25  ;;  %4661 = vst [vmem:[#allocation26_spill] sm:$0xff] %v3673_v50  ;;  %v3681_v56 = vmul.f32 %v3386_v42, %v3317_v28 }
 0x1d1   : > { %v2643_v5 = vpop.eup %2642  ;;  %v3676_v46 = vmul.f32 %v2641_v17, %v3544_v6  ;;  %2662 = vrcp.f32 %v899_v31  ;;  %v2275_v21 = vmul.f32 -1.442695, %v3664_v52  ;;  %1167 = vadd.xlane.f32.xlu1 %v1166_v58  ;;  %v1112_v26 = vadd.f32 %v3660_v15, %v3652_v47 }
 0x1d2   : > { %v2645_v20 = vpop.eup %2644  ;;  %4662 = vst [vmem:[#allocation27_spill] sm:$0xff] %v3681_v56  ;;  %v3684_v43 = vmul.f32 %v2643_v5, %v3549_v10  ;;  %2664 = vrcp.f32 %v900_v32  ;;  %v638_v8 = vpop.f32.mrb[56].mxu0  ;;  %v2276_v31 = vmul.f32 -1.442695, %v3669_v55 }
 0x1d3   : > { %v2647_v0 = vpop.eup %2646  ;;  %v901_v6 = vadd.f32 1.0, %v2645_v20  ;;  %2666 = vpow2.f32 %v2274_v54  ;;  %v3690_v49 = vadd.f32 %v638_v8, %v3308_v23  ;;  %v640_v58 = vpop.f32.mrb[57].mxu0 }
 0x1d4   : > { %v2649_v17 = vpop.eup %2648  ;;  %v902_v28 = vadd.f32 1.0, %v2647_v0  ;;  %2668 = vpow2.f32 %v2275_v21  ;;  %v3693_v42 = vadd.f32 %v640_v58, %v3311_v25  ;;  %v1169_v10 = vadd.f32 %v3684_v43, %v3676_v46 }
 0x1d5   : > { %v2651_v32 = vpop.eup %2650  ;;  %v3698_v5 = vmul.f32 %v2649_v17, %v3560_v34  ;;  %2670 = vrcp.f32 %v901_v6  ;;  %v2277_v54 = vmul.f32 -1.442695, %v3690_v49  ;;  %1113 = vadd.xlane.f32.xlu1 %v1112_v26  ;;  %v1109_v0 = vadd.f32 %v3681_v56, %v3673_v50 }
 0x1d6   : > { %v2653_v20 = vpop.eup %2652  ;;  %v3702_v8 = vmul.f32 %v2651_v32, %v3566_v29  ;;  %2672 = vrcp.f32 %v902_v28  ;;  %1170 = vadd.xlane.f32.xlu0 %v1169_v10  ;;  %v644_v21 = vpop.f32.mrb[58].mxu0  ;;  %v2278_v34 = vmul.f32 -1.442695, %v3693_v42 }
 0x1d7   : > { %v2655_v58 = vpop.eup %2654  ;;  %v903_v15 = vadd.f32 1.0, %v2653_v20  ;;  %2674 = vpow2.f32 %v2276_v31  ;;  %v3708_v6 = vadd.f32 %v644_v21, %v3308_v23  ;;  %v646_v17 = vpop.f32.mrb[59].mxu0 }
 0x1d8   : > { %v2657_v26 = vpop.eup %2656  ;;  %v904_v47 = vadd.f32 1.0, %v2655_v58  ;;  %2676 = vpow2.f32 %v2277_v54  ;;  %v3711_v29 = vadd.f32 %v646_v17, %v3311_v25  ;;  %v1172_v28 = vadd.f32 %v3702_v8, %v3698_v5 }
 0x1d9   : > { %v2659_v10 = vpop.eup %2658  ;;  %v3716_v32 = vmul.f32 %v2657_v26, %v3576_v44  ;;  %2678 = vrcp.f32 %v903_v15  ;;  %v2279_v31 = vmul.f32 -1.442695, %v3708_v6 }
 0x1da   : > { %v2661_v20 = vpop.eup %2660  ;;  %2680 = vrcp.f32 %v904_v47  ;;  %v905_v21 = vadd.f32 1.0, %v2659_v10  ;;  %v2280_v56 = vmul.f32 -1.442695, %v3711_v29  ;;  %1173 = vadd.xlane.f32.xlu1 %v1172_v28  ;;  %1110 = vadd.xlane.f32.xlu0 %v1109_v0  ;;  %v3720_v54 = vpop.f32.mrb[60].mxu0 }
 0x1db   : > { %v2663_v58 = vpop.eup %2662  ;;  %v3723_v17 = vmul.f32 %v2661_v20, %v3582_v22  ;;  %2682 = vpow2.f32 %v2278_v34  ;;  %v3725_v50 = vpop.f32.mrb[61].mxu0 }
 0x1dc   : > { %v2665_v44 = vpop.eup %2664  ;;  %v3728_v15 = vmul.f32 %v2663_v58, %v3592_v11  ;;  %2684 = vrcp.f32 %v905_v21 }
 0x1dd   : > { %4663 = vst [vmem:[#allocation28_spill] sm:$0xff] %v3723_v17  ;;  %v2667_v47 = vpop.eup %2666  ;;  %v3731_v26 = vmul.f32 %v2665_v44, %v3595_v27  ;;  %2686 = vpow2.f32 %v2279_v31  ;;  %v1175_v0 = vadd.f32 %v3723_v17, %v3716_v32 }
 0x1de   : > { %4664 = vst [vmem:[#allocation29_spill] sm:$0xff] %v3728_v15  ;;  %v2669_v28 = vpop.eup %2668  ;;  %v906_v10 = vadd.f32 1.0, %v2667_v47  ;;  %2688 = vpow2.f32 %v2280_v56  ;;  %v3735_v22 = vpop.f32.mrb[62].mxu0 }
 0x1df   : > { %4665 = vst [vmem:[#allocation30_spill] sm:$0xff] %v3731_v26  ;;  %v2671_v34 = vpop.eup %2670  ;;  %v907_v20 = vadd.f32 1.0, %v2669_v28  ;;  %1176 = vadd.xlane.f32.xlu0 %v1175_v0  ;;  %v1178_v11 = vadd.f32 %v3731_v26, %v3728_v15  ;;  %v3739_v21 = vpop.f32.mrb[63].mxu0 }
 0x1e0   : > { %v2673_v58 = vpop.eup %2672  ;;  %v3742_v27 = vmul.f32 %v2671_v34, %v3611_v13  ;;  %2690 = vrcp.f32 %v906_v10 }
 0x1e1   : > { %v2675_v31 = vpop.eup %2674  ;;  %v3745_v44 = vmul.f32 %v2673_v58, %v3614_v61  ;;  %2692 = vrcp.f32 %v907_v20  ;;  %1179 = vadd.xlane.f32.xlu1 %v1178_v11 }
 0x1e2   : > { %v2677_v56 = vpop.eup %2676  ;;  %v908_v47 = vadd.f32 1.0, %v2675_v31 }
 0x1e3   : > { %v2679_v28 = vpop.eup %2678  ;;  %v909_v0 = vadd.f32 1.0, %v2677_v56  ;;  %v1181_v26 = vadd.f32 %v3745_v44, %v3742_v27 }
 0x1e4   : > { %v2681_v15 = vpop.eup %2680  ;;  %v3750_v17 = vmul.f32 %v2679_v28, %v3627_v19  ;;  %2694 = vrcp.f32 %v908_v47 }
 0x1e5   : > { %v2683_v13 = vpop.eup %2682  ;;  %v3753_v10 = vmul.f32 %v2681_v15, %v3630_v62  ;;  %2696 = vrcp.f32 %v909_v0  ;;  %1182 = vadd.xlane.f32.xlu0 %v1181_v26 }
 0x1e6   : > { %v2685_v61 = vpop.eup %2684  ;;  %v910_v34 = vadd.f32 1.0, %v2683_v13 }
 0x1e7   : > { %v2687_v20 = vpop.eup %2686  ;;  %v1184_v11 = vadd.f32 %v3753_v10, %v3750_v17  ;;  %v3758_v56 = vmul.f32 %v2685_v61, %v3643_v41 }
 0x1e8   : > { %v2689_v58 = vpop.eup %2688  ;;  %2698 = vrcp.f32 %v910_v34  ;;  %v911_v31 = vadd.f32 1.0, %v2687_v20 }
 0x1e9   : > { %v912_v19 = vadd.f32 1.0, %v2689_v58  ;;  %1185 = vadd.xlane.f32.xlu0 %v1184_v11 }
 0x1ea   : > { %v2691_v47 = vpop.eup %2690  ;;  %2700 = vrcp.f32 %v911_v31 }
 0x1eb   : > { %v2693_v62 = vpop.eup %2692  ;;  %v3761_v15 = vmul.f32 %v2691_v47, %v3646_v37  ;;  %2702 = vrcp.f32 %v912_v19  ;;  %v2998_v19 = vmov 0.0|0.0   ;;  %v1775_v47 = vld [vmem:[#allocation7 + $0x8] sm:$0xff] }
 0x1ec   : > { %v3764_v26 = vmul.f32 %v2693_v62, %v3664_v52  ;;  %2373 = vmatprep.subr.bf16.mxu1 %v2998_v19  ;;  %2325 = vmatprep.subr.bf16.mxu0 %v2998_v19 }
 0x1ed   : > { %v1187_v28 = vadd.f32 %v3761_v15, %v3758_v56 }
 0x1ee   : > { %v2695_v0 = vpop.eup %2694 }
 0x1ef   : > { %v2697_v13 = vpop.eup %2696  ;;  %v3769_v41 = vmul.f32 %v2695_v0, %v3669_v55  ;;  %1188 = vadd.xlane.f32.xlu0 %v1187_v28  ;;  %v1776_v28 = vld [vmem:[#allocation7 + $0x10] sm:$0xff]  ;;  %v1777_v0 = vld [vmem:[#allocation7 + $0x18] sm:$0xff] }
 0x1f0   : > { %v3772_v61 = vmul.f32 %v2697_v13, %v3690_v49  ;;  %v3801_v13 = vadd.f32 %v3326_v33, %v3308_v23 }
 0x1f1   : > { %v1190_v37 = vadd.f32 %v3769_v41, %v3764_v26 }
 0x1f2   : > { %v2699_v34 = vpop.eup %2698  ;;  %v2225_v33 = vmul.f32 -1.442695, %v3801_v13 }
 0x1f3   : > { %v3777_v20 = vmul.f32 %v2699_v34, %v3693_v42  ;;  %1191 = vadd.xlane.f32.xlu0 %v1190_v37  ;;  %v3791_v42 = vadd.f32 %v3720_v54, %v3308_v23  ;;  %v2329_v37 = vpack.c.bf16 %v1777_v0, %v1776_v28  ;;  %v3826_v0 = vadd.f32 %v3735_v22, %v3308_v23  ;;  %v1784_v22 = vld [vmem:[#allocation7 + $0x50] sm:$0xff] }
 0x1f4   : > { %v2701_v52 = vpop.eup %2700 }
 0x1f5   : > { %v2703_v11 = vpop.eup %2702  ;;  %v3780_v58 = vmul.f32 %v2701_v52, %v3708_v6  ;;  %v1193_v55 = vadd.f32 %v3777_v20, %v3772_v61  ;;  %v3797_v6 = vadd.f32 %v3725_v50, %v3311_v25  ;;  %v2281_v54 = vmul.f32 -1.442695, %v3791_v42  ;;  %v1778_v50 = vld [vmem:[#allocation7 + $0x20] sm:$0xff]  ;;  %v1779_v52 = vld [vmem:[#allocation7 + $0x28] sm:$0xff] }
 0x1f6   : > { %v3785_v31 = vmul.f32 %v2703_v11, %v3711_v29  ;;  %v1774_v29 = vld [vmem:[#allocation7] sm:$0xff]  ;;  %v3809_v11 = vadd.f32 %v3329_v35, %v3311_v25 }
 0x1f7   : > { %4666 = vst [vmem:[#allocation31_spill] sm:$0xff] %v3780_v58  ;;  %1194 = vadd.xlane.f32.xlu1 %v1193_v55  ;;  %v2326_v62 = vpack.c.bf16 %v1775_v47, %v1774_v29  ;;  %v2282_v34 = vmul.f32 -1.442695, %v3797_v6  ;;  %2704 = vpow2.f32 %v2281_v54  ;;  %v2332_v55 = vpack.c.bf16 %v1779_v52, %v1778_v50  ;;  %v1780_v29 = vld [vmem:[#allocation7 + $0x30] sm:$0xff]  ;;  %v1781_v47 = vld [vmem:[#allocation7 + $0x38] sm:$0xff]  ;;  %v1782_v54 = vld [vmem:[#allocation7 + $0x40] sm:$0xff] }
 0x1f8   : > { %4667 = vst [vmem:[#allocation32_spill] sm:$0xff] %v3785_v31  ;;  %v1196_v49 = vadd.f32 %v3785_v31, %v3780_v58  ;;  %v2226_v35 = vmul.f32 -1.442695, %v3809_v11  ;;  %v2335_v28 = vpack.c.bf16 %v1781_v47, %v1780_v29  ;;  %v1785_v52 = vld [vmem:[#allocation7 + $0x58] sm:$0xff] }
 0x1f9   : > { %2389 = vmatpush1.bf16.msra.mxu1 %v2326_v62  ;;  %2327 = vmatpush1.bf16.msra.mxu0 %v2326_v62  ;;  %2706 = vpow2.f32 %v2282_v34  ;;  %v3821_v62 = vadd.f32 %v3335_v39, %v3311_v25  ;;  %v3833_v34 = vadd.f32 %v3739_v21, %v3311_v25  ;;  %v2341_v25 = vpack.c.bf16 %v1785_v52, %v1784_v22  ;;  %v1789_v52 = vld [vmem:[#allocation7 + $0x78] sm:$0xff] }
 0x1fa   : > { %1197 = vadd.xlane.f32.xlu0 %v1196_v49  ;;  %2374 = vmatprep.subr.bf16.mxu1 %v2998_v19  ;;  %v3814_v49 = vadd.f32 %v3333_v38, %v3308_v23  ;;  %2708 = vpow2.f32 %v2225_v33  ;;  %v2283_v23 = vmul.f32 -1.442695, %v3826_v0 }
 0x1fb   : > { %2328 = vmatprep.subr.bf16.mxu0 %v2998_v19  ;;  %2710 = vpow2.f32 %v2226_v35  ;;  %v2228_v39 = vmul.f32 -1.442695, %v3821_v62  ;;  %v1786_v35 = vld [vmem:[#allocation7 + $0x60] sm:$0xff] }
 0x1fc   : > { %v2227_v38 = vmul.f32 -1.442695, %v3814_v49 }
 0x1fd   : > { %2390 = vmatpush1.bf16.msra.mxu1 %v2329_v37  ;;  %2330 = vmatpush1.bf16.msra.mxu0 %v2329_v37  ;;  %v1783_v37 = vld [vmem:[#allocation7 + $0x48] sm:$0xff] }
 0x1fe   : > { %2375 = vmatprep.subr.bf16.mxu1 %v2998_v19  ;;  %2331 = vmatprep.subr.bf16.mxu0 %v2998_v19  ;;  %v2338_v50 = vpack.c.bf16 %v1783_v37, %v1782_v54  ;;  %2712 = vpow2.f32 %v2227_v38 }
 0x1ff   : > { %2714 = vpow2.f32 %v2228_v39 }
 0x200   : > { %2716 = vpow2.f32 %v2283_v23  ;;  %v1788_v23 = vld [vmem:[#allocation7 + $0x70] sm:$0xff] }
 0x201   : > { %2391 = vmatpush1.bf16.msra.mxu1 %v2332_v55  ;;  %2333 = vmatpush1.bf16.msra.mxu0 %v2332_v55  ;;  %v2705_v33 = vpop.eup %2704  ;;  %v2284_v55 = vmul.f32 -1.442695, %v3833_v34 }
 0x202   : > { %2376 = vmatprep.subr.bf16.mxu1 %v2998_v19  ;;  %2334 = vmatprep.subr.bf16.mxu0 %v2998_v19  ;;  %v913_v21 = vadd.f32 1.0, %v2705_v33 }
 0x203   : > { %v2707_v29 = vpop.eup %2706  ;;  %2718 = vpow2.f32 %v2284_v55 }
 0x204   : > { %v2709_v38 = vpop.eup %2708  ;;  %v914_v54 = vadd.f32 1.0, %v2707_v29  ;;  %2720 = vrcp.f32 %v913_v21 }
 0x205   : > { %2392 = vmatpush1.bf16.msra.mxu1 %v2335_v28  ;;  %2336 = vmatpush1.bf16.msra.mxu0 %v2335_v28  ;;  %v1787_v28 = vld [vmem:[#allocation7 + $0x68] sm:$0xff]  ;;  %v2711_v39 = vpop.eup %2710  ;;  %v857_v33 = vadd.f32 1.0, %v2709_v38 }
 0x206   : > { %2377 = vmatprep.subr.bf16.mxu1 %v2998_v19  ;;  %2337 = vmatprep.subr.bf16.mxu0 %v2998_v19  ;;  %2722 = vrcp.f32 %v914_v54  ;;  %v1790_v54 = vld [vmem:[#allocation7 + $0x80] sm:$0xff] }
 0x207   : > { %2724 = vrcp.f32 %v857_v33 }
 0x208   : > { %v2713_v29 = vpop.eup %2712 }
 0x209   : > { %2393 = vmatpush1.bf16.msra.mxu1 %v2338_v50  ;;  %2339 = vmatpush1.bf16.msra.mxu0 %v2338_v50  ;;  %v2344_v50 = vpack.c.bf16 %v1787_v28, %v1786_v35  ;;  %v2347_v35 = vpack.c.bf16 %v1789_v52, %v1788_v23  ;;  %v2715_v28 = vpop.eup %2714 }
 0x20a   : > { %2378 = vmatprep.subr.bf16.mxu1 %v2998_v19  ;;  %2340 = vmatprep.subr.bf16.mxu0 %v2998_v19  ;;  %v2717_v23 = vpop.eup %2716  ;;  %v860_v52 = vadd.f32 1.0, %v2715_v28 }
 0x20d   : > { %2394 = vmatpush1.bf16.msra.mxu1 %v2341_v25  ;;  %2342 = vmatpush1.bf16.msra.mxu0 %v2341_v25 }
 0x20e   : > { %2379 = vmatprep.subr.bf16.mxu1 %v2998_v19  ;;  %2343 = vmatprep.subr.bf16.mxu0 %v2998_v19 }
 0x211   : > { %2395 = vmatpush1.bf16.msra.mxu1 %v2344_v50  ;;  %2345 = vmatpush1.bf16.msra.mxu0 %v2344_v50 }
 0x212   : > { %2380 = vmatprep.subr.bf16.mxu1 %v2998_v19  ;;  %2346 = vmatprep.subr.bf16.mxu0 %v2998_v19 }
 0x215   : > { %2396 = vmatpush1.bf16.msra.mxu1 %v2347_v35  ;;  %2348 = vmatpush1.bf16.msra.mxu0 %v2347_v35 }
 0x216   : > { %2381 = vmatprep.subr.bf16.mxu1 %v2998_v19  ;;  %2349 = vmatprep.subr.bf16.mxu0 %v2998_v19 }
 0x223   : > { %v1123_v47 = vpop.xlane.xlu0 %1122 }
 0x224   : > { %v1210_v37 = vmul.f32 0.00390625, %v1123_v47  ;;  %v858_v47 = vadd.f32 1.0, %v2711_v39  ;;  %v859_v39 = vadd.f32 1.0, %v2713_v29 }
 0x226   : > { %v3842_v31 = vsub.f32 %v3408_v7, %v1210_v37  ;;  %v3845_v22 = vsub.f32 %v3413_v16, %v1210_v37  ;;  %2726 = vrcp.f32 %v858_v47  ;;  %v1792_v47 = vld [vmem:[#allocation7 + $0x90] sm:$0xff] }
 0x227   : > { %v1126_v58 = vpop.xlane.xlu0 %1125  ;;  %2728 = vrcp.f32 %v859_v39 }
 0x228   : > { %4668 = vst [vmem:[#allocation33_spill] sm:$0xff] %v3842_v31  ;;  %v1211_v55 = vmul.f32 0.00390625, %v1126_v58  ;;  %v1310_v7 = vmul.f32 %v3842_v31, %v3842_v31  ;;  %v1311_v16 = vmul.f32 %v3845_v22, %v3845_v22  ;;  %v1791_v31 = vld [vmem:[#allocation7 + $0x88] sm:$0xff]  ;;  %2730 = vrcp.f32 %v860_v52 }
 0x229   : > { %v2350_v33 = vpack.c.bf16 %v1791_v31, %v1790_v54 }
 0x22a   : > { %v3854_v25 = vsub.f32 %v3416_v18, %v1211_v55  ;;  %v3857_v21 = vsub.f32 %v3428_v40, %v1211_v55  ;;  %v1129_v38 = vpop.xlane.xlu1 %1128  ;;  %v1378_v37 = vadd.f32 %v1311_v16, %v1310_v7  ;;  %v2719_v7 = vpop.eup %2718 }
 0x22b   : > { %v1212_v58 = vmul.f32 0.00390625, %v1129_v38  ;;  %v916_v31 = vadd.f32 1.0, %v2719_v7  ;;  %2397 = vmatpush1.bf16.msra.mxu1 %v2350_v33  ;;  %2351 = vmatpush1.bf16.msra.mxu0 %v2350_v33 }
 0x22c   : > { %4669 = vst [vmem:[#allocation34_spill] sm:$0xff] %v3854_v25  ;;  %1379 = vadd.xlane.f32.xlu1 %v1378_v37  ;;  %v1312_v18 = vmul.f32 %v3854_v25, %v3854_v25  ;;  %v1313_v40 = vmul.f32 %v3857_v21, %v3857_v21  ;;  %v1795_v25 = vld [vmem:[#allocation7 + $0xa8] sm:$0xff]  ;;  %2382 = vmatprep.subr.bf16.mxu1 %v2998_v19 }
 0x22d   : > { %v3866_v50 = vsub.f32 %v3435_v53, %v1212_v58  ;;  %v3869_v55 = vsub.f32 %v3444_v1, %v1212_v58  ;;  %v1793_v53 = vld [vmem:[#allocation7 + $0x98] sm:$0xff]  ;;  %v915_v1 = vadd.f32 1.0, %v2717_v23  ;;  %v2721_v58 = vpop.eup %2720  ;;  %2352 = vmatprep.subr.bf16.mxu0 %v2998_v19 }
 0x22e   : > { %v1381_v16 = vadd.f32 %v1313_v40, %v1312_v18  ;;  %v2723_v54 = vpop.eup %2722  ;;  %v3890_v52 = vmul.f32 %v2721_v58, %v3791_v42 }
 0x22f   : > { %4670 = vst [vmem:[#allocation35_spill] sm:$0xff] %v3866_v50  ;;  %4671 = vst [vmem:[#allocation36_spill] sm:$0xff] %v3869_v55  ;;  %v1132_v29 = vpop.xlane.xlu1 %1131  ;;  %v1314_v38 = vmul.f32 %v3866_v50, %v3866_v50  ;;  %v1315_v37 = vmul.f32 %v3869_v55, %v3869_v55  ;;  %v2353_v50 = vpack.c.bf16 %v1793_v53, %v1792_v47  ;;  %v1794_v55 = vld [vmem:[#allocation7 + $0xa0] sm:$0xff]  ;;  %2732 = vrcp.f32 %v915_v1  ;;  %v2725_v33 = vpop.eup %2724 }
 0x230   : > { %v1213_v28 = vmul.f32 0.00390625, %v1132_v29  ;;  %1382 = vadd.xlane.f32.xlu1 %v1381_v16  ;;  %v3893_v7 = vmul.f32 %v2723_v54, %v3797_v6  ;;  %2734 = vrcp.f32 %v916_v31  ;;  %v2356_v16 = vpack.c.bf16 %v1795_v25, %v1794_v55  ;;  %v2727_v47 = vpop.eup %2726  ;;  %v1796_v54 = vld [vmem:[#allocation7 + $0xb0] sm:$0xff] }
 0x231   : > { %v1384_v35 = vadd.f32 %v1315_v37, %v1314_v38  ;;  %2398 = vmatpush1.bf16.msra.mxu1 %v2353_v50  ;;  %2354 = vmatpush1.bf16.msra.mxu0 %v2353_v50  ;;  %v3908_v25 = vmul.f32 %v2725_v33, %v3801_v13  ;;  %v2729_v55 = vpop.eup %2728  ;;  %v3911_v50 = vmul.f32 %v2727_v47, %v3809_v11  ;;  %v1797_v11 = vld [vmem:[#allocation7 + $0xb8] sm:$0xff] }
 0x232   : > { %v3878_v18 = vsub.f32 %v3456_v24, %v1213_v28  ;;  %v3881_v40 = vsub.f32 %v3460_v36, %v1213_v28  ;;  %2383 = vmatprep.subr.bf16.mxu1 %v2998_v19  ;;  %2355 = vmatprep.subr.bf16.mxu0 %v2998_v19  ;;  %v1199_v1 = vadd.f32 %v3893_v7, %v3890_v52  ;;  %v2731_v58 = vpop.eup %2730 }
 0x233   : > { %v1135_v39 = vpop.xlane.xlu0 %1134  ;;  %v3937_v33 = vmul.f32 %v2731_v58, %v3821_v62  ;;  %v1799_v62 = vld [vmem:[#allocation7 + $0xc8] sm:$0xff] }
 0x234   : > { %v1214_v23 = vmul.f32 0.00390625, %v1135_v39  ;;  %1385 = vadd.xlane.f32.xlu1 %v1384_v35  ;;  %v1316_v24 = vmul.f32 %v3878_v18, %v3878_v18  ;;  %v1317_v36 = vmul.f32 %v3881_v40, %v3881_v40  ;;  %v2359_v39 = vpack.c.bf16 %v1797_v11, %v1796_v54 }
 0x235   : > { %2399 = vmatpush1.bf16.msra.mxu1 %v2356_v16  ;;  %2357 = vmatpush1.bf16.msra.mxu0 %v2356_v16  ;;  %v3934_v16 = vmul.f32 %v2729_v55, %v3814_v49  ;;  %v1798_v49 = vld [vmem:[#allocation7 + $0xc0] sm:$0xff] }
 0x236   : > { %v3896_v29 = vsub.f32 %v3472_v60, %v1214_v23  ;;  %v3899_v38 = vsub.f32 %v3476_v57, %v1214_v23  ;;  %v1387_v37 = vadd.f32 %v1317_v36, %v1316_v24  ;;  %2384 = vmatprep.subr.bf16.mxu1 %v2998_v19  ;;  %2358 = vmatprep.subr.bf16.mxu0 %v2998_v19 }
 0x237   : > { %v1118_v11 = vadd.f32 %v3937_v33, %v3934_v16 }
 0x238   : > { %v1138_v42 = vpop.xlane.xlu1 %1137  ;;  %1388 = vadd.xlane.f32.xlu1 %v1387_v37  ;;  %v1318_v6 = vmul.f32 %v3896_v29, %v3896_v29  ;;  %v1319_v60 = vmul.f32 %v3899_v38, %v3899_v38 }
 0x239   : > { %v1215_v57 = vmul.f32 0.00390625, %v1138_v42  ;;  %v2733_v36 = vpop.eup %2732  ;;  %2400 = vmatpush1.bf16.msra.mxu1 %v2359_v39  ;;  %2360 = vmatpush1.bf16.msra.mxu0 %v2359_v39  ;;  %v1801_v39 = vld [vmem:[#allocation7 + $0xd8] sm:$0xff] }
 0x23a   : > { %v1141_v53 = vpop.xlane.xlu0 %1140  ;;  %v1390_v28 = vadd.f32 %v1319_v60, %v1318_v6  ;;  %2385 = vmatprep.subr.bf16.mxu1 %v2998_v19  ;;  %2361 = vmatprep.subr.bf16.mxu0 %v2998_v19 }
 0x23b   : > { %v3916_v31 = vsub.f32 %v3488_v30, %v1215_v57  ;;  %v3919_v35 = vsub.f32 %v3493_v51, %v1215_v57  ;;  %v1216_v13 = vmul.f32 0.00390625, %v1141_v53  ;;  %v2362_v57 = vpack.c.bf16 %v1799_v62, %v1798_v49 }
 0x23c   : > { %1200 = vadd.xlane.f32.xlu1 %v1199_v1  ;;  %1391 = vadd.xlane.f32.xlu0 %v1390_v28  ;;  %v3954_v28 = vmul.f32 %v2733_v36, %v3826_v0  ;;  %v1800_v0 = vld [vmem:[#allocation7 + $0xd0] sm:$0xff] }
 0x23d   : > { %v3924_v23 = vsub.f32 %v3499_v59, %v1216_v13  ;;  %v3927_v24 = vsub.f32 %v3505_v3, %v1216_v13  ;;  %v1320_v30 = vmul.f32 %v3916_v31, %v3916_v31  ;;  %v1321_v51 = vmul.f32 %v3919_v35, %v3919_v35  ;;  %v2735_v3 = vpop.eup %2734  ;;  %2401 = vmatpush1.bf16.msra.mxu1 %v2362_v57 }
 0x23e   : > { %v1144_v37 = vpop.xlane.xlu1 %1143  ;;  %v1115_v59 = vadd.f32 %v3911_v50, %v3908_v25  ;;  %v3957_v58 = vmul.f32 %v2735_v3, %v3833_v34  ;;  %2363 = vmatpush1.bf16.msra.mxu0 %v2362_v57  ;;  %2386 = vmatprep.subr.bf16.mxu1 %v2998_v19  ;;  %v2365_v34 = vpack.c.bf16 %v1801_v39, %v1800_v0  ;;  %v4673_v57 = vld [vmem:[#allocation15_spill] sm:$0xff] }
 0x23f   : > { %v1217_v47 = vmul.f32 0.00390625, %v1144_v37  ;;  %v1393_v42 = vadd.f32 %v1321_v51, %v1320_v30  ;;  %v1322_v6 = vmul.f32 %v3924_v23, %v3924_v23  ;;  %v1323_v60 = vmul.f32 %v3927_v24, %v3927_v24  ;;  %2364 = vmatprep.subr.bf16.mxu0 %v2998_v19  ;;  %v4672_v51 = vld [vmem:[#allocation14_spill] sm:$0xff] }
 0x240   : > { %1116 = vadd.xlane.f32.xlu0 %v1115_v59  ;;  %v1202_v59 = vadd.f32 %v3957_v58, %v3954_v28 }
 0x241   : > { %v3948_v55 = vsub.f32 %v3517_v48, %v1217_v47  ;;  %v3951_v53 = vsub.f32 %v3523_v45, %v1217_v47  ;;  %1394 = vadd.xlane.f32.xlu1 %v1393_v42  ;;  %v1396_v1 = vadd.f32 %v1323_v60, %v1322_v6  ;;  %2402 = vmatpush1.bf16.msra.mxu1 %v2365_v34  ;;  %v1803_v42 = vld [vmem:[#allocation7 + $0xe8] sm:$0xff] }
 0x242   : > { %v1147_v13 = vpop.xlane.xlu0 %1146  ;;  %2366 = vmatpush1.bf16.msra.mxu0 %v2365_v34  ;;  %2387 = vmatprep.subr.bf16.mxu1 %v2998_v19 }
 0x243   : > { %v1218_v54 = vmul.f32 0.00390625, %v1147_v13  ;;  %v1324_v48 = vmul.f32 %v3948_v55, %v3948_v55  ;;  %v1325_v45 = vmul.f32 %v3951_v53, %v3951_v53  ;;  %2367 = vmatprep.subr.bf16.mxu0 %v2998_v19  ;;  %v4674_v13 = vld [vmem:[#allocation16_spill] sm:$0xff] }
 0x244   : > { %1397 = vadd.xlane.f32.xlu0 %v1396_v1 }
 0x245   : > { %v3968_v30 = vsub.f32 %v3533_v14, %v1218_v54  ;;  %v3971_v36 = vsub.f32 %v4672_v51, %v1218_v54  ;;  %1119 = vadd.xlane.f32.xlu1 %v1118_v11  ;;  %v1399_v37 = vadd.f32 %v1325_v45, %v1324_v48  ;;  %v1802_v14 = vld [vmem:[#allocation7 + $0xe0] sm:$0xff]  ;;  %v1804_v11 = vld [vmem:[#allocation7 + $0xf0] sm:$0xff]  ;;  %v1805_v48 = vld [vmem:[#allocation7 + $0xf8] sm:$0xff] }
 0x246   : > { %v2368_v60 = vpack.c.bf16 %v1803_v42, %v1802_v14  ;;  %v2371_v0 = vpack.c.bf16 %v1805_v48, %v1804_v11 }
 0x247   : > { %v1326_v3 = vmul.f32 %v3968_v30, %v3968_v30  ;;  %v1327_v47 = vmul.f32 %v3971_v36, %v3971_v36 }
 0x248   : > { %v1150_v6 = vpop.xlane.xlu1 %1149  ;;  %1203 = vadd.xlane.f32.xlu0 %v1202_v59  ;;  %2403 = vmatpush1.bf16.msra.mxu1 %v2368_v60  ;;  %v4675_v59 = vld [vmem:[#allocation17_spill] sm:$0xff] }
 0x249   : > { %v1219_v49 = vmul.f32 0.00390625, %v1150_v6  ;;  %1400 = vadd.xlane.f32.xlu1 %v1399_v37  ;;  %v1402_v62 = vadd.f32 %v1327_v47, %v1326_v3  ;;  %2369 = vmatpush1.bf16.msra.mxu0 %v2368_v60  ;;  %v4676_v60 = vld [vmem:[#allocation18_spill] sm:$0xff] }
 0x24a   : > { %2388 = vmatprep.subr.bf16.mxu1 %v2998_v19  ;;  %2370 = vmatprep.subr.bf16.mxu0 %v2998_v19 }
 0x24b   : > { %v3982_v1 = vsub.f32 %v4673_v57, %v1219_v49  ;;  %v3985_v54 = vsub.f32 %v4674_v13, %v1219_v49 }
 0x24c   : > { %v1153_v45 = vpop.xlane.xlu0 %1152  ;;  %1403 = vadd.xlane.f32.xlu0 %v1402_v62  ;;  %2404 = vmatpush1.bf16.msra.mxu1 %v2371_v0  ;;  %v4677_v62 = vld [vmem:[#allocation19_spill] sm:$0xff] }
 0x24d   : > { %v1220_v39 = vmul.f32 0.00390625, %v1153_v45  ;;  %v1328_v34 = vmul.f32 %v3982_v1, %v3982_v1  ;;  %v1329_v51 = vmul.f32 %v3985_v54, %v3985_v54  ;;  %2372 = vmatpush1.bf16.msra.mxu0 %v2371_v0 }
 0x24f   : > { %v3994_v37 = vsub.f32 %v3563_v4, %v1220_v39  ;;  %v3997_v3 = vsub.f32 %v4675_v59, %v1220_v39  ;;  %v1405_v47 = vadd.f32 %v1329_v51, %v1328_v34  ;;  %v4678_v39 = vld [vmem:[#allocation20_spill] sm:$0xff] }
 0x250   : > { %v1156_v19 = vpop.xlane.xlu1 %1155 }
 0x251   : > { %v1221_v14 = vmul.f32 0.00390625, %v1156_v19  ;;  %1406 = vadd.xlane.f32.xlu1 %v1405_v47  ;;  %v1330_v42 = vmul.f32 %v3994_v37, %v3994_v37  ;;  %v1331_v6 = vmul.f32 %v3997_v3, %v3997_v3 }
 0x253   : > { %v4004_v49 = vsub.f32 %v4676_v60, %v1221_v14  ;;  %v4007_v57 = vsub.f32 %v4677_v62, %v1221_v14  ;;  %v1159_v4 = vpop.xlane.xlu0 %1158  ;;  %v1408_v13 = vadd.f32 %v1331_v6, %v1330_v42  ;;  %v4679_v42 = vld [vmem:[#allocation21_spill] sm:$0xff]  ;;  %v4680_v60 = vld [vmem:[#allocation22_spill] sm:$0xff] }
 0x254   : > { %v1222_v11 = vmul.f32 0.00390625, %v1159_v4 }
 0x255   : > { %1409 = vadd.xlane.f32.xlu0 %v1408_v13  ;;  %v1332_v48 = vmul.f32 %v4004_v49, %v4004_v49  ;;  %v1333_v45 = vmul.f32 %v4007_v57, %v4007_v57 }
 0x256   : > { %v4014_v0 = vsub.f32 %v3598_v63, %v1222_v11  ;;  %v4017_v34 = vsub.f32 %v4678_v39, %v1222_v11  ;;  %v4681_v39 = vld [vmem:[#allocation23_spill] sm:$0xff] }
 0x257   : > { %v1162_v51 = vpop.xlane.xlu1 %1161  ;;  %v1411_v59 = vadd.f32 %v1333_v45, %v1332_v48 }
 0x258   : > { %v1223_v47 = vmul.f32 0.00390625, %v1162_v51  ;;  %v1334_v19 = vmul.f32 %v4014_v0, %v4014_v0  ;;  %v1335_v14 = vmul.f32 %v4017_v34, %v4017_v34 }
 0x259   : > { %1412 = vadd.xlane.f32.xlu1 %v1411_v59 }
 0x25a   : > { %v4024_v6 = vsub.f32 %v4679_v42, %v1223_v47  ;;  %v4027_v62 = vsub.f32 %v4680_v60, %v1223_v47  ;;  %v1414_v63 = vadd.f32 %v1335_v14, %v1334_v19 }
 0x25b   : > { %v1165_v4 = vpop.xlane.xlu0 %1164 }
 0x25c   : > { %v1224_v13 = vmul.f32 0.00390625, %v1165_v4  ;;  %1415 = vadd.xlane.f32.xlu0 %v1414_v63  ;;  %v1336_v11 = vmul.f32 %v4024_v6, %v4024_v6  ;;  %v1337_v48 = vmul.f32 %v4027_v62, %v4027_v62 }
 0x25e   : > { %v4034_v45 = vsub.f32 %v3624_v12, %v1224_v13  ;;  %v4037_v51 = vsub.f32 %v4681_v39, %v1224_v13  ;;  %v1168_v59 = vpop.xlane.xlu1 %1167  ;;  %v1417_v42 = vadd.f32 %v1337_v48, %v1336_v11 }
 0x25f   : > { %v1225_v47 = vmul.f32 0.00390625, %v1168_v59 }
 0x260   : > { %1418 = vadd.xlane.f32.xlu1 %v1417_v42  ;;  %v1338_v19 = vmul.f32 %v4034_v45, %v4034_v45  ;;  %v1339_v14 = vmul.f32 %v4037_v51, %v4037_v51 }
 0x261   : > { %v4044_v60 = vsub.f32 %v3640_v2, %v1225_v47  ;;  %v4047_v63 = vsub.f32 %v3655_v9, %v1225_v47 }
 0x262   : > { %v1114_v12 = vpop.xlane.xlu1 %1113  ;;  %v1420_v4 = vadd.f32 %v1339_v14, %v1338_v19 }
 0x263   : > { %4682 = vst [vmem:[#allocation14_spill] sm:$0xff] %v4044_v60  ;;  %v1171_v13 = vpop.xlane.xlu0 %1170  ;;  %v1340_v11 = vmul.f32 %v4044_v60, %v4044_v60  ;;  %v1341_v48 = vmul.f32 %v4047_v63, %v4047_v63 }
 0x264   : > { %v1226_v39 = vmul.f32 0.00390625, %v1171_v13  ;;  %1421 = vadd.xlane.f32.xlu0 %v1420_v4 }
 0x265   : > { %v1423_v59 = vadd.f32 %v1341_v48, %v1340_v11 }
 0x266   : > { %v4054_v42 = vsub.f32 %v3676_v46, %v1226_v39  ;;  %v4057_v2 = vsub.f32 %v3684_v43, %v1226_v39 }
 0x267   : > { %v1174_v9 = vpop.xlane.xlu1 %1173  ;;  %v1111_v47 = vpop.xlane.xlu0 %1110  ;;  %1424 = vadd.xlane.f32.xlu1 %v1423_v59 }
 0x268   : > { %4683 = vst [vmem:[#allocation15_spill] sm:$0xff] %v4054_v42  ;;  %4684 = vst [vmem:[#allocation16_spill] sm:$0xff] %v4057_v2  ;;  %v1227_v19 = vmul.f32 0.00390625, %v1174_v9  ;;  %v1342_v14 = vmul.f32 %v4054_v42, %v4054_v42  ;;  %v1343_v60 = vmul.f32 %v4057_v2, %v4057_v2 }
 0x26a   : > { %v4064_v13 = vsub.f32 %v3698_v5, %v1227_v19  ;;  %v4067_v4 = vsub.f32 %v3702_v8, %v1227_v19  ;;  %v1426_v46 = vadd.f32 %v1343_v60, %v1342_v14  ;;  %v4686_v5 = vld [vmem:[#allocation28_spill] sm:$0xff]  ;;  %v4687_v60 = vld [vmem:[#allocation29_spill] sm:$0xff]  ;;  %v4689_v14 = vld [vmem:[#allocation30_spill] sm:$0xff] }
 0x26c   : > { %4685 = vst [vmem:[#allocation17_spill] sm:$0xff] %v4064_v13  ;;  %v1177_v11 = vpop.xlane.xlu0 %1176  ;;  %v1344_v43 = vmul.f32 %v4064_v13, %v4064_v13  ;;  %v1345_v48 = vmul.f32 %v4067_v4, %v4067_v4  ;;  %1427 = vadd.xlane.f32.xlu0 %v1426_v46 }
 0x26d   : > { %v1228_v39 = vmul.f32 0.00390625, %v1177_v11 }
 0x26e   : > { %v1180_v59 = vpop.xlane.xlu1 %1179  ;;  %v1429_v9 = vadd.f32 %v1345_v48, %v1344_v43 }
 0x26f   : > { %v4074_v42 = vsub.f32 %v3716_v32, %v1228_v39  ;;  %v4077_v2 = vsub.f32 %v4686_v5, %v1228_v39  ;;  %v1229_v8 = vmul.f32 0.00390625, %v1180_v59 }
 0x270   : > { %1430 = vadd.xlane.f32.xlu1 %v1429_v9 }
 0x271   : > { %v4080_v19 = vsub.f32 %v4687_v60, %v1229_v8  ;;  %v4083_v13 = vsub.f32 %v4689_v14, %v1229_v8  ;;  %v1346_v11 = vmul.f32 %v4074_v42, %v4074_v42  ;;  %v1347_v46 = vmul.f32 %v4077_v2, %v4077_v2 }
 0x272   : > { %v1183_v43 = vpop.xlane.xlu0 %1182 }
 0x273   : > { %4688 = vst [vmem:[#allocation18_spill] sm:$0xff] %v4080_v19  ;;  %4690 = vst [vmem:[#allocation19_spill] sm:$0xff] %v4083_v13  ;;  %v1230_v32 = vmul.f32 0.00390625, %v1183_v43  ;;  %v1432_v48 = vadd.f32 %v1347_v46, %v1346_v11  ;;  %v1348_v39 = vmul.f32 %v4080_v19, %v4080_v19  ;;  %v1349_v59 = vmul.f32 %v4083_v13, %v4083_v13 }
 0x275   : > { %v4094_v9 = vsub.f32 %v3742_v27, %v1230_v32  ;;  %v4097_v5 = vsub.f32 %v3745_v44, %v1230_v32  ;;  %1433 = vadd.xlane.f32.xlu0 %v1432_v48  ;;  %v1435_v8 = vadd.f32 %v1349_v59, %v1348_v39  ;;  %v1206_v44 = vmul.f32 0.00390625, %v1111_v47 }
 0x276   : > { %v1186_v60 = vpop.xlane.xlu0 %1185 }
 0x277   : > { %4691 = vst [vmem:[#allocation20_spill] sm:$0xff] %v4094_v9  ;;  %4692 = vst [vmem:[#allocation21_spill] sm:$0xff] %v4097_v5  ;;  %v1231_v14 = vmul.f32 0.00390625, %v1186_v60  ;;  %1436 = vadd.xlane.f32.xlu1 %v1435_v8  ;;  %v1350_v11 = vmul.f32 %v4094_v9, %v4094_v9  ;;  %v1351_v46 = vmul.f32 %v4097_v5, %v4097_v5  ;;  %v1207_v60 = vmul.f32 0.00390625, %v1114_v12  ;;  %v4693_v9 = vld [vmem:[#allocation26_spill] sm:$0xff] }
 0x278   : > { %v4114_v5 = vsub.f32 %v4693_v9, %v1206_v44  ;;  %v4697_v9 = vld [vmem:[#allocation24_spill] sm:$0xff] }
 0x279   : > { %v4104_v43 = vsub.f32 %v3750_v17, %v1231_v14  ;;  %v4107_v27 = vsub.f32 %v3753_v10, %v1231_v14  ;;  %v1438_v19 = vadd.f32 %v1351_v46, %v1350_v11  ;;  %v4695_v17 = vld [vmem:[#allocation27_spill] sm:$0xff]  ;;  %v4130_v46 = vsub.f32 %v4697_v9, %v1207_v60 }
 0x27a   : > { %4694 = vst [vmem:[#allocation22_spill] sm:$0xff] %v4114_v5  ;;  %v4117_v13 = vsub.f32 %v4695_v17, %v1206_v44  ;;  %v4699_v44 = vld [vmem:[#allocation25_spill] sm:$0xff] }
 0x27b   : > { %1439 = vadd.xlane.f32.xlu0 %v1438_v19  ;;  %v1352_v32 = vmul.f32 %v4104_v43, %v4104_v43  ;;  %v1353_v48 = vmul.f32 %v4107_v27, %v4107_v27  ;;  %4698 = vst [vmem:[#allocation28_spill] sm:$0xff] %v4130_v46 }
 0x27c   : > { %v1189_v39 = vpop.xlane.xlu0 %1188  ;;  %4696 = vst [vmem:[#allocation23_spill] sm:$0xff] %v4117_v13 }
 0x27d   : > { %v1232_v59 = vmul.f32 0.00390625, %v1189_v39  ;;  %v1441_v8 = vadd.f32 %v1353_v48, %v1352_v32  ;;  %v4133_v32 = vsub.f32 %v4699_v44, %v1207_v60 }
 0x27f   : > { %v4120_v10 = vsub.f32 %v3758_v56, %v1232_v59  ;;  %v4123_v47 = vsub.f32 %v3761_v15, %v1232_v59  ;;  %1442 = vadd.xlane.f32.xlu1 %v1441_v8  ;;  %4700 = vst [vmem:[#allocation29_spill] sm:$0xff] %v4133_v32  ;;  %v1302_v56 = vmul.f32 %v4114_v5, %v4114_v5 }
 0x280   : > { %v1192_v19 = vpop.xlane.xlu0 %1191  ;;  %v1303_v59 = vmul.f32 %v4117_v13, %v4117_v13  ;;  %v4704_v13 = vld [vmem:[#allocation31_spill] sm:$0xff] }
 0x281   : > { %v1233_v14 = vmul.f32 0.00390625, %v1192_v19  ;;  %v1354_v11 = vmul.f32 %v4120_v10, %v4120_v10  ;;  %v1355_v12 = vmul.f32 %v4123_v47, %v4123_v47 }
 0x282   : > { %v1366_v9 = vadd.f32 %v1303_v59, %v1302_v56 }
 0x283   : > { %v4138_v15 = vsub.f32 %v3764_v26, %v1233_v14  ;;  %v4141_v48 = vsub.f32 %v3769_v41, %v1233_v14  ;;  %v1444_v39 = vadd.f32 %v1355_v12, %v1354_v11  ;;  %v1304_v26 = vmul.f32 %v4130_v46, %v4130_v46 }
 0x284   : > { %v1195_v8 = vpop.xlane.xlu1 %1194  ;;  %v1305_v41 = vmul.f32 %v4133_v32, %v4133_v32 }
 0x285   : > { %4701 = vst [vmem:[#allocation30_spill] sm:$0xff] %v4138_v15  ;;  %v1234_v17 = vmul.f32 0.00390625, %v1195_v8  ;;  %1445 = vadd.xlane.f32.xlu0 %v1444_v39  ;;  %v1356_v60 = vmul.f32 %v4138_v15, %v4138_v15  ;;  %v1357_v19 = vmul.f32 %v4141_v48, %v4141_v48 }
 0x287   : > { %v4154_v14 = vsub.f32 %v3772_v61, %v1234_v17  ;;  %v4157_v11 = vsub.f32 %v3777_v20, %v1234_v17  ;;  %v1198_v12 = vpop.xlane.xlu0 %1197  ;;  %v1447_v44 = vadd.f32 %v1357_v19, %v1356_v60  ;;  %v4706_v61 = vld [vmem:[#allocation32_spill] sm:$0xff]  ;;  %v1369_v20 = vadd.f32 %v1305_v41, %v1304_v26 }
 0x288   : > { %v1235_v39 = vmul.f32 0.00390625, %v1198_v12  ;;  %v1622_v41 = vld [vmem:[%s4582_s3] sm:$0x3] }
 0x289   : > { %4702 = vst [vmem:[#allocation26_spill] sm:$0xff] %v4154_v14  ;;  %4703 = vst [vmem:[#allocation27_spill] sm:$0xff] %v4157_v11  ;;  %1367 = vadd.xlane.f32.xlu0 %v1366_v9  ;;  %1448 = vadd.xlane.f32.xlu1 %v1447_v44  ;;  %v1358_v8 = vmul.f32 %v4154_v14, %v4154_v14  ;;  %v1359_v46 = vmul.f32 %v4157_v11, %v4157_v11 }
 0x28a   : > { %v4164_v32 = vsub.f32 %v4704_v13, %v1235_v39  ;;  %v4167_v5 = vsub.f32 %v4706_v61, %v1235_v39 }
 0x28b   : > { %v1450_v17 = vadd.f32 %v1359_v46, %v1358_v8 }
 0x28c   : > { %4705 = vst [vmem:[#allocation24_spill] sm:$0xff] %v4164_v32  ;;  %4707 = vst [vmem:[#allocation25_spill] sm:$0xff] %v4167_v5  ;;  %v1360_v56 = vmul.f32 %v4164_v32, %v4164_v32  ;;  %v1361_v59 = vmul.f32 %v4167_v5, %v4167_v5 }
 0x28d   : > { %1370 = vadd.xlane.f32.xlu0 %v1369_v20  ;;  %1451 = vadd.xlane.f32.xlu1 %v1450_v17  ;;  %v1698_v17 = vld [vmem:[%s4583_s4] sm:$0x3] }
 0x28e   : > { %v1453_v60 = vadd.f32 %v1361_v59, %v1360_v56  ;;  %v4708_v56 = vld [vmem:[#allocation12_spill] sm:$0xff] }
 0x28f   : > { %v4180_v59 = vrot.slane %v1622_v41, %v4708_v56 }
 0x291   : > { %1454 = vadd.xlane.f32.xlu1 %v1453_v60  ;;  %v4709_v60 = vld [vmem:[#allocation13_spill] sm:$0xff] }
 0x2b9   : > { %v1380_v19 = vpop.xlane.xlu1 %1379 }
 0x2ba   : > { %v1466_v12 = vmul.f32 0.00390625, %v1380_v19  ;;  %v4183_v19 = vrot.slane %v1622_v41, %v4709_v60 }
 0x2bc   : > { %v1498_v9 = vadd.f32 1e-05, %v1466_v12 }
 0x2bd   : > { %v1383_v13 = vpop.xlane.xlu1 %1382 }
 0x2be   : > { %2736 = vrsqrt.f32 %v1498_v9  ;;  %v1467_v44 = vmul.f32 0.00390625, %v1383_v13 }
 0x2c0   : > { %v1499_v39 = vadd.f32 1e-05, %v1467_v44 }
 0x2c1   : > { %v1386_v61 = vpop.xlane.xlu1 %1385 }
 0x2c2   : > { %2738 = vrsqrt.f32 %v1499_v39  ;;  %v1468_v46 = vmul.f32 0.00390625, %v1386_v61  ;;  %v4187_v61 = vrot.slane %v1698_v17, %v4708_v56 }
 0x2c4   : > { %v1500_v26 = vadd.f32 1e-05, %v1468_v46  ;;  %v4190_v46 = vrot.slane %v1698_v17, %v4709_v60 }
 0x2c5   : > { %v1389_v8 = vpop.xlane.xlu1 %1388 }
 0x2c6   : > { %2740 = vrsqrt.f32 %v1500_v26  ;;  %v1469_v20 = vmul.f32 0.00390625, %v1389_v8  ;;  %v4710_v26 = vld [vmem:[#allocation33_spill] sm:$0xff] }
 0x2c8   : > { %v2737_v12 = vpop.eup %2736  ;;  %v1501_v9 = vadd.f32 1e-05, %v1469_v20 }
 0x2c9   : > { %v1201_v13 = vpop.xlane.xlu1 %1200  ;;  %v1392_v44 = vpop.xlane.xlu0 %1391  ;;  %v1567_v39 = vmul.f32 %v2737_v12, %v3845_v22  ;;  %v1566_v8 = vmul.f32 %v2737_v12, %v4710_v26 }
 0x2ca   : > { %2742 = vrsqrt.f32 %v1501_v9  ;;  %v1236_v32 = vmul.f32 0.00390625, %v1201_v13  ;;  %v1470_v5 = vmul.f32 0.00390625, %v1392_v44  ;;  %v4712_v9 = vld [vmem:[#allocation34_spill] sm:$0xff] }
 0x2cb   : > { %v1643_v41 = vmul.f32 %v4183_v19, %v1567_v39  ;;  %v1642_v14 = vmul.f32 %v4180_v59, %v1566_v8 }
 0x2cc   : > { %v2739_v20 = vpop.eup %2738  ;;  %v4196_v11 = vsub.f32 %v3890_v52, %v1236_v32  ;;  %v4199_v22 = vsub.f32 %v3893_v7, %v1236_v32  ;;  %v1502_v56 = vadd.f32 1e-05, %v1470_v5 }
 0x2cd   : > { %v1117_v15 = vpop.xlane.xlu0 %1116  ;;  %v1719_v17 = vadd.f32 %v4190_v46, %v1643_v41  ;;  %v1718_v60 = vadd.f32 %v4187_v61, %v1642_v14  ;;  %v1569_v12 = vmul.f32 %v2739_v20, %v3857_v21  ;;  %v1568_v13 = vmul.f32 %v2739_v20, %v4712_v9 }
 0x2ce   : > { %4711 = vst [vmem:[#allocation31_spill] sm:$0xff] %v4196_v11  ;;  %2744 = vrsqrt.f32 %v1502_v56  ;;  %v1395_v44 = vpop.xlane.xlu1 %1394  ;;  %v1208_v39 = vmul.f32 0.00390625, %v1117_v15  ;;  %v1362_v52 = vmul.f32 %v4196_v11, %v4196_v11  ;;  %v1363_v7 = vmul.f32 %v4199_v22, %v4199_v22 }
 0x2cf   : > { %v1471_v32 = vmul.f32 0.00390625, %v1395_v44  ;;  %1897 = vmatprep.mubr.f32.mxu1 %v1719_v17  ;;  %v1645_v5 = vmul.f32 %v4183_v19, %v1569_v12  ;;  %v1644_v26 = vmul.f32 %v4180_v59, %v1568_v13  ;;  %v4713_v17 = vld [vmem:[#allocation36_spill] sm:$0xff]  ;;  %v4714_v13 = vld [vmem:[#allocation35_spill] sm:$0xff] }
 0x2d0   : > { %v2741_v14 = vpop.eup %2740  ;;  %v4212_v21 = vsub.f32 %v3908_v25, %v1208_v39  ;;  %v4215_v8 = vsub.f32 %v3911_v50, %v1208_v39  ;;  %1898 = vmatmul.mubr.f32.vlgmr.msra.gmra.mrb[0].mxu1 %v1718_v60  ;;  %v1456_v15 = vadd.f32 %v1363_v7, %v1362_v52 }
 0x2d1   : > { %v1503_v41 = vadd.f32 1e-05, %v1471_v32  ;;  %v1398_v20 = vpop.xlane.xlu0 %1397  ;;  %v1721_v56 = vadd.f32 %v4190_v46, %v1645_v5  ;;  %v1720_v9 = vadd.f32 %v4187_v61, %v1644_v26  ;;  %v1571_v44 = vmul.f32 %v2741_v14, %v4713_v17 }
 0x2d2   : > { %v1120_v12 = vpop.xlane.xlu1 %1119  ;;  %v1472_v11 = vmul.f32 0.00390625, %v1398_v20  ;;  %1457 = vadd.xlane.f32.xlu1 %v1456_v15  ;;  %v1306_v25 = vmul.f32 %v4212_v21, %v4212_v21  ;;  %v1307_v50 = vmul.f32 %v4215_v8, %v4215_v8  ;;  %v1570_v60 = vmul.f32 %v2741_v14, %v4714_v13 }
 0x2d3   : > { %2746 = vrsqrt.f32 %v1503_v41  ;;  %v1209_v39 = vmul.f32 0.00390625, %v1120_v12  ;;  %1902 = vmatprep.mubr.f32.mxu1 %v1721_v56  ;;  %v1647_v52 = vmul.f32 %v4183_v19, %v1571_v44 }
 0x2d4   : > { %v2743_v7 = vpop.eup %2742  ;;  %v1504_v32 = vadd.f32 1e-05, %v1472_v11  ;;  %1903 = vmatmul.mubr.f32.gmra.mrb[2].mxu1 %v1720_v9  ;;  %v1372_v5 = vadd.f32 %v1307_v50, %v1306_v25  ;;  %v1646_v26 = vmul.f32 %v4180_v59, %v1570_v60 }
 0x2d5   : > { %v4228_v15 = vsub.f32 %v3934_v16, %v1209_v39  ;;  %v4231_v20 = vsub.f32 %v3937_v33, %v1209_v39  ;;  %v1204_v17 = vpop.xlane.xlu0 %1203  ;;  %v1723_v14 = vadd.f32 %v4190_v46, %v1647_v52  ;;  %v1573_v41 = vmul.f32 %v2743_v7, %v3881_v40 }
 0x2d6   : > { %2748 = vrsqrt.f32 %v1504_v32  ;;  %v1401_v56 = vpop.xlane.xlu1 %1400  ;;  %v1237_v44 = vmul.f32 0.00390625, %v1204_v17  ;;  %1373 = vadd.xlane.f32.xlu0 %v1372_v5  ;;  %v1722_v11 = vadd.f32 %v4187_v61, %v1646_v26  ;;  %v1572_v9 = vmul.f32 %v2743_v7, %v3878_v18 }
 0x2d7   : > { %v1473_v12 = vmul.f32 0.00390625, %v1401_v56  ;;  %1907 = vmatprep.mubr.f32.mxu1 %v1723_v14  ;;  %v1308_v16 = vmul.f32 %v4228_v15, %v4228_v15  ;;  %v1309_v33 = vmul.f32 %v4231_v20, %v4231_v20  ;;  %v1649_v25 = vmul.f32 %v4183_v19, %v1573_v41 }
 0x2d8   : > { %v2745_v50 = vpop.eup %2744  ;;  %v4243_v40 = vsub.f32 %v3954_v28, %v1237_v44  ;;  %v4246_v13 = vsub.f32 %v3957_v58, %v1237_v44  ;;  %1908 = vmatmul.mubr.f32.gmra.mrb[4].mxu1 %v1722_v11  ;;  %v1648_v18 = vmul.f32 %v4180_v59, %v1572_v9 }
 0x2d9   : > { %v1505_v60 = vadd.f32 1e-05, %v1473_v12  ;;  %v1404_v39 = vpop.xlane.xlu0 %1403  ;;  %v1375_v52 = vadd.f32 %v1309_v33, %v1308_v16  ;;  %v1725_v7 = vadd.f32 %v4190_v46, %v1649_v25  ;;  %v1575_v32 = vmul.f32 %v2745_v50, %v3899_v38 }
 0x2da   : > { %v1474_v5 = vmul.f32 0.00390625, %v1404_v39  ;;  %v1724_v26 = vadd.f32 %v4187_v61, %v1648_v18  ;;  %v1364_v28 = vmul.f32 %v4243_v40, %v4243_v40  ;;  %v1365_v58 = vmul.f32 %v4246_v13, %v4246_v13 }
 0x2db   : > { %2750 = vrsqrt.f32 %v1505_v60  ;;  %1376 = vadd.xlane.f32.xlu0 %v1375_v52  ;;  %1912 = vmatprep.mubr.f32.mxu1 %v1725_v7  ;;  %v1651_v17 = vmul.f32 %v4183_v19, %v1575_v32  ;;  %v1574_v14 = vmul.f32 %v2745_v50, %v3896_v29 }
 0x2dc   : > { %v1506_v41 = vadd.f32 1e-05, %v1474_v5  ;;  %1913 = vmatmul.mubr.f32.gmra.mrb[6].mxu1 %v1724_v26  ;;  %v1459_v56 = vadd.f32 %v1365_v58, %v1364_v28 }
 0x2dd   : > { %v2747_v38 = vpop.eup %2746  ;;  %v1727_v44 = vadd.f32 %v4190_v46, %v1651_v17  ;;  %v1650_v11 = vmul.f32 %v4180_v59, %v1574_v14 }
 0x2de   : > { %2752 = vrsqrt.f32 %v1506_v41  ;;  %v1407_v9 = vpop.xlane.xlu1 %1406  ;;  %1460 = vadd.xlane.f32.xlu1 %v1459_v56  ;;  %v1577_v12 = vmul.f32 %v2747_v38, %v3919_v35  ;;  %v1576_v16 = vmul.f32 %v2747_v38, %v3916_v31 }
 0x2df   : > { %v1475_v33 = vmul.f32 0.00390625, %v1407_v9  ;;  %1917 = vmatprep.mubr.f32.mxu1 %v1727_v44  ;;  %v1726_v25 = vadd.f32 %v4187_v61, %v1650_v11 }
 0x2e0   : > { %v2749_v29 = vpop.eup %2748  ;;  %v1653_v50 = vmul.f32 %v4183_v19, %v1577_v12  ;;  %v1652_v18 = vmul.f32 %v4180_v59, %v1576_v16 }
 0x2e1   : > { %v1507_v60 = vadd.f32 1e-05, %v1475_v33  ;;  %1918 = vmatmul.mubr.f32.gmra.mrb[8].mxu1 %v1726_v25  ;;  %v1579_v39 = vmul.f32 %v2749_v29, %v3927_v24  ;;  %v1578_v52 = vmul.f32 %v2749_v29, %v3924_v23 }
 0x2e2   : > { %v1410_v7 = vpop.xlane.xlu0 %1409  ;;  %v1729_v35 = vadd.f32 %v4190_v46, %v1653_v50  ;;  %v1728_v31 = vadd.f32 %v4187_v61, %v1652_v18 }
 0x2e3   : > { %2754 = vrsqrt.f32 %v1507_v60  ;;  %v1476_v32 = vmul.f32 0.00390625, %v1410_v7  ;;  %v1655_v5 = vmul.f32 %v4183_v19, %v1579_v39  ;;  %v1654_v26 = vmul.f32 %v4180_v59, %v1578_v52 }
 0x2e4   : > { %1922 = vmatprep.mubr.f32.mxu1 %v1729_v35 }
 0x2e5   : > { %v2751_v28 = vpop.eup %2750  ;;  %v1508_v58 = vadd.f32 1e-05, %v1476_v32  ;;  %1923 = vmatmul.mubr.f32.gmra.mrb[10].mxu1 %v1728_v31  ;;  %v1731_v17 = vadd.f32 %v4190_v46, %v1655_v5  ;;  %v1730_v24 = vadd.f32 %v4187_v61, %v1654_v26 }
 0x2e6   : > { %v1413_v23 = vpop.xlane.xlu1 %1412  ;;  %v1581_v14 = vmul.f32 %v2751_v28, %v3951_v53  ;;  %v1580_v41 = vmul.f32 %v2751_v28, %v3948_v55 }
 0x2e7   : > { %2756 = vrsqrt.f32 %v1508_v58  ;;  %v1477_v56 = vmul.f32 0.00390625, %v1413_v23  ;;  %1927 = vmatprep.mubr.f32.mxu1 %v1731_v17 }
 0x2e8   : > { %v2753_v38 = vpop.eup %2752  ;;  %v1657_v44 = vmul.f32 %v4183_v19, %v1581_v14  ;;  %v1656_v11 = vmul.f32 %v4180_v59, %v1580_v41 }
 0x2e9   : > { %v1509_v9 = vadd.f32 1e-05, %v1477_v56  ;;  %1928 = vmatmul.mubr.f32.gmra.mrb[12].mxu1 %v1730_v24  ;;  %v1416_v12 = vpop.xlane.xlu0 %1415  ;;  %v1583_v16 = vmul.f32 %v2753_v38, %v3971_v36  ;;  %v1582_v33 = vmul.f32 %v2753_v38, %v3968_v30 }
 0x2ea   : > { %v1478_v25 = vmul.f32 0.00390625, %v1416_v12  ;;  %v1733_v53 = vadd.f32 %v4190_v46, %v1657_v44  ;;  %v1732_v55 = vadd.f32 %v4187_v61, %v1656_v11 }
 0x2eb   : > { %2758 = vrsqrt.f32 %v1509_v9  ;;  %v1659_v29 = vmul.f32 %v4183_v19, %v1583_v16  ;;  %v1658_v50 = vmul.f32 %v4180_v59, %v1582_v33 }
 0x2ec   : > { %v1510_v18 = vadd.f32 1e-05, %v1478_v25  ;;  %1932 = vmatprep.mubr.f32.mxu1 %v1733_v53 }
 0x2ed   : > { %v2755_v60 = vpop.eup %2754  ;;  %1933 = vmatmul.mubr.f32.gmra.mrb[14].mxu1 %v1732_v55  ;;  %v1419_v39 = vpop.xlane.xlu1 %1418  ;;  %v1735_v52 = vadd.f32 %v4190_v46, %v1659_v29  ;;  %v1734_v36 = vadd.f32 %v4187_v61, %v1658_v50 }
 0x2ee   : > { %2760 = vrsqrt.f32 %v1510_v18  ;;  %v1479_v30 = vmul.f32 0.00390625, %v1419_v39  ;;  %v1585_v7 = vmul.f32 %v2755_v60, %v3985_v54  ;;  %v1584_v35 = vmul.f32 %v2755_v60, %v3982_v1 }
 0x2ef   : > { %1937 = vmatprep.mubr.f32.mxu1 %v1735_v52 }
 0x2f0   : > { %v1511_v31 = vadd.f32 1e-05, %v1479_v30  ;;  %v1661_v32 = vmul.f32 %v4183_v19, %v1585_v7  ;;  %v1660_v5 = vmul.f32 %v4180_v59, %v1584_v35 }
 0x2f1   : > { %v2757_v26 = vpop.eup %2756  ;;  %1938 = vmatmul.mubr.f32.gmra.mrb[16].mxu1 %v1734_v36  ;;  %v1422_v28 = vpop.xlane.xlu0 %1421 }
 0x2f2   : > { %2762 = vrsqrt.f32 %v1511_v31  ;;  %v1480_v58 = vmul.f32 0.00390625, %v1422_v28  ;;  %v1737_v17 = vadd.f32 %v4190_v46, %v1661_v32  ;;  %v1736_v24 = vadd.f32 %v4187_v61, %v1660_v5 }
 0x2f3   : > { %v1587_v23 = vmul.f32 %v2757_v26, %v3997_v3  ;;  %v1586_v54 = vmul.f32 %v2757_v26, %v3994_v37 }
 0x2f4   : > { %v1512_v1 = vadd.f32 1e-05, %v1480_v58  ;;  %1942 = vmatprep.mubr.f32.mxu1 %v1737_v17  ;;  %v1425_v14 = vpop.xlane.xlu1 %1424 }
 0x2f5   : > { %v2759_v41 = vpop.eup %2758  ;;  %1943 = vmatmul.mubr.f32.gmra.mrb[18].mxu1 %v1736_v24  ;;  %v1481_v56 = vmul.f32 0.00390625, %v1425_v14  ;;  %v1663_v38 = vmul.f32 %v4183_v19, %v1587_v23  ;;  %v1662_v44 = vmul.f32 %v4180_v59, %v1586_v54 }
 0x2f6   : > { %2764 = vrsqrt.f32 %v1512_v1  ;;  %v1589_v11 = vmul.f32 %v2759_v41, %v4007_v57  ;;  %v1588_v9 = vmul.f32 %v2759_v41, %v4004_v49 }
 0x2f7   : > { %v1513_v12 = vadd.f32 1e-05, %v1481_v56  ;;  %v1739_v3 = vadd.f32 %v4190_v46, %v1663_v38  ;;  %v1738_v37 = vadd.f32 %v4187_v61, %v1662_v44  ;;  %v4715_v56 = vld [vmem:[#allocation14_spill] sm:$0xff] }
 0x2f8   : > { %v2761_v16 = vpop.eup %2760  ;;  %v1665_v33 = vmul.f32 %v4183_v19, %v1589_v11  ;;  %v1664_v25 = vmul.f32 %v4180_v59, %v1588_v9 }
 0x2f9   : > { %2766 = vrsqrt.f32 %v1513_v12  ;;  %1947 = vmatprep.mubr.f32.mxu1 %v1739_v3  ;;  %v1591_v53 = vmul.f32 %v2761_v16, %v4017_v34  ;;  %v1590_v55 = vmul.f32 %v2761_v16, %v4014_v0  ;;  %v1428_v57 = vpop.xlane.xlu0 %1427 }
 0x2fa   : > { %1948 = vmatmul.mubr.f32.gmra.mrb[20].mxu1 %v1738_v37  ;;  %v1741_v49 = vadd.f32 %v4190_v46, %v1665_v33  ;;  %v1740_v29 = vadd.f32 %v4187_v61, %v1664_v25  ;;  %v1482_v50 = vmul.f32 0.00390625, %v1428_v57  ;;  %v4717_v57 = vld [vmem:[#allocation15_spill] sm:$0xff] }
 0x2fb   : > { %v1667_v18 = vmul.f32 %v4183_v19, %v1591_v53  ;;  %v1666_v60 = vmul.f32 %v4180_v59, %v1590_v55  ;;  %v4716_v53 = vld [vmem:[#allocation16_spill] sm:$0xff] }
 0x2fc   : > { %v2763_v39 = vpop.eup %2762  ;;  %1952 = vmatprep.mubr.f32.mxu1 %v1741_v49  ;;  %v1514_v52 = vadd.f32 1e-05, %v1482_v50 }
 0x2fd   : > { %v1431_v36 = vpop.xlane.xlu1 %1430  ;;  %v1743_v30 = vadd.f32 %v4190_v46, %v1667_v18  ;;  %v1593_v34 = vmul.f32 %v2763_v39, %v4027_v62  ;;  %v1742_v7 = vadd.f32 %v4187_v61, %v1666_v60  ;;  %v1592_v35 = vmul.f32 %v2763_v39, %v4024_v6 }
 0x2fe   : > { %1953 = vmatmul.mubr.f32.gmra.mrb[22].mxu1 %v1740_v29  ;;  %v1483_v0 = vmul.f32 0.00390625, %v1431_v36  ;;  %2768 = vrsqrt.f32 %v1514_v52 }
 0x2ff   : > { %1957 = vmatprep.mubr.f32.mxu1 %v1743_v30  ;;  %v1669_v31 = vmul.f32 %v4183_v19, %v1593_v34  ;;  %v1668_v26 = vmul.f32 %v4180_v59, %v1592_v35  ;;  %v4718_v30 = vld [vmem:[#allocation17_spill] sm:$0xff] }
 0x300   : > { %v2765_v32 = vpop.eup %2764  ;;  %v1515_v5 = vadd.f32 1e-05, %v1483_v0 }
 0x301   : > { %v1745_v28 = vadd.f32 %v4190_v46, %v1669_v31  ;;  %v1595_v58 = vmul.f32 %v2765_v32, %v4037_v51  ;;  %v1594_v62 = vmul.f32 %v2765_v32, %v4034_v45  ;;  %v1744_v24 = vadd.f32 %v4187_v61, %v1668_v26 }
 0x302   : > { %2770 = vrsqrt.f32 %v1515_v5  ;;  %1958 = vmatmul.mubr.f32.gmra.mrb[24].mxu1 %v1742_v7  ;;  %v1434_v17 = vpop.xlane.xlu0 %1433 }
 0x303   : > { %v2767_v6 = vpop.eup %2766  ;;  %v1484_v23 = vmul.f32 0.00390625, %v1434_v17  ;;  %1962 = vmatprep.mubr.f32.mxu1 %v1745_v28  ;;  %v1671_v54 = vmul.f32 %v4183_v19, %v1595_v58  ;;  %v1670_v1 = vmul.f32 %v4180_v59, %v1594_v62 }
 0x304   : > { %v1437_v14 = vpop.xlane.xlu1 %1436  ;;  %v1597_v41 = vmul.f32 %v2767_v6, %v4047_v63  ;;  %v1596_v38 = vmul.f32 %v2767_v6, %v4715_v56 }
 0x305   : > { %v1516_v51 = vadd.f32 1e-05, %v1484_v23  ;;  %v1485_v44 = vmul.f32 0.00390625, %v1437_v14  ;;  %v1747_v45 = vadd.f32 %v4190_v46, %v1671_v54  ;;  %v1746_v11 = vadd.f32 %v4187_v61, %v1670_v1  ;;  %v4719_v54 = vld [vmem:[#allocation19_spill] sm:$0xff]  ;;  %v4720_v14 = vld [vmem:[#allocation18_spill] sm:$0xff] }
 0x306   : > { %1963 = vmatmul.mubr.f32.gmra.mrb[26].mxu1 %v1744_v24  ;;  %v1673_v9 = vmul.f32 %v4183_v19, %v1597_v41  ;;  %v1672_v12 = vmul.f32 %v4180_v59, %v1596_v38 }
 0x307   : > { %2772 = vrsqrt.f32 %v1516_v51  ;;  %v1517_v3 = vadd.f32 1e-05, %v1485_v44  ;;  %1967 = vmatprep.mubr.f32.mxu1 %v1747_v45 }
 0x308   : > { %v1440_v37 = vpop.xlane.xlu0 %1439  ;;  %v1749_v16 = vadd.f32 %v4190_v46, %v1673_v9  ;;  %v2769_v63 = vpop.eup %2768  ;;  %v1748_v25 = vadd.f32 %v4187_v61, %v1672_v12 }
 0x309   : > { %2774 = vrsqrt.f32 %v1517_v3  ;;  %v1486_v33 = vmul.f32 0.00390625, %v1440_v37  ;;  %v1599_v55 = vmul.f32 %v2769_v63, %v4716_v53  ;;  %v1598_v49 = vmul.f32 %v2769_v63, %v4717_v57  ;;  %v4721_v37 = vld [vmem:[#allocation21_spill] sm:$0xff]  ;;  %v4722_v63 = vld [vmem:[#allocation20_spill] sm:$0xff] }
 0x30a   : > { %1968 = vmatmul.mubr.f32.gmra.mrb[28].mxu1 %v1746_v11 }
 0x30b   : > { %v1518_v29 = vadd.f32 1e-05, %v1486_v33  ;;  %1972 = vmatprep.mubr.f32.mxu1 %v1749_v16  ;;  %v1675_v60 = vmul.f32 %v4183_v19, %v1599_v55  ;;  %v1674_v39 = vmul.f32 %v4180_v59, %v1598_v49 }
 0x30c   : > { %v2771_v50 = vpop.eup %2770  ;;  %v1443_v18 = vpop.xlane.xlu1 %1442 }
 0x30d   : > { %2776 = vrsqrt.f32 %v1518_v29  ;;  %v1487_v52 = vmul.f32 0.00390625, %v1443_v18  ;;  %v1601_v36 = vmul.f32 %v2771_v50, %v4067_v4  ;;  %v1600_v34 = vmul.f32 %v2771_v50, %v4718_v30 }
 0x30e   : > { %1973 = vmatmul.mubr.f32.gmra.mrb[30].mxu1 %v1748_v25  ;;  %v1751_v0 = vadd.f32 %v4190_v46, %v1675_v60  ;;  %v1750_v7 = vadd.f32 %v4187_v61, %v1674_v39 }
 0x30f   : > { %v1519_v35 = vadd.f32 1e-05, %v1487_v52  ;;  %v1677_v31 = vmul.f32 %v4183_v19, %v1601_v36  ;;  %v1676_v32 = vmul.f32 %v4180_v59, %v1600_v34 }
 0x310   : > { %1977 = vmatprep.mubr.f32.mxu1 %v1751_v0 }
 0x311   : > { %v2773_v5 = vpop.eup %2772  ;;  %2778 = vrsqrt.f32 %v1519_v35  ;;  %v1753_v26 = vadd.f32 %v4190_v46, %v1677_v31  ;;  %v1752_v4 = vadd.f32 %v4187_v61, %v1676_v32 }
 0x312   : > { %1978 = vmatmul.mubr.f32.gmra.mrb[32].mxu1 %v1750_v7  ;;  %v1446_v28 = vpop.xlane.xlu0 %1445  ;;  %v1603_v58 = vmul.f32 %v2773_v5, %v4077_v2  ;;  %v1602_v62 = vmul.f32 %v2773_v5, %v4074_v42 }
 0x313   : > { %v2775_v17 = vpop.eup %2774  ;;  %v1488_v24 = vmul.f32 0.00390625, %v1446_v28  ;;  %1982 = vmatprep.mubr.f32.mxu1 %v1753_v26 }
 0x314   : > { %v1679_v6 = vmul.f32 %v4183_v19, %v1603_v58  ;;  %v1678_v23 = vmul.f32 %v4180_v59, %v1602_v62  ;;  %v1605_v1 = vmul.f32 %v2775_v17, %v4719_v54  ;;  %v1604_v41 = vmul.f32 %v2775_v17, %v4720_v14  ;;  %v4723_v14 = vld [vmem:[#allocation30_spill] sm:$0xff] }
 0x315   : > { %v1520_v56 = vadd.f32 1e-05, %v1488_v24 }
 0x316   : > { %1983 = vmatmul.mubr.f32.gmra.mrb[34].mxu1 %v1752_v4  ;;  %v1449_v38 = vpop.xlane.xlu1 %1448  ;;  %v1368_v51 = vpop.xlane.xlu0 %1367  ;;  %v1755_v44 = vadd.f32 %v4190_v46, %v1679_v6  ;;  %v1754_v2 = vadd.f32 %v4187_v61, %v1678_v23  ;;  %v1681_v42 = vmul.f32 %v4183_v19, %v1605_v1  ;;  %v1680_v45 = vmul.f32 %v4180_v59, %v1604_v41 }
 0x317   : > { %v2777_v11 = vpop.eup %2776  ;;  %2780 = vrsqrt.f32 %v1520_v56  ;;  %v1489_v9 = vmul.f32 0.00390625, %v1449_v38  ;;  %v1462_v12 = vmul.f32 0.00390625, %v1368_v51 }
 0x318   : > { %1987 = vmatprep.mubr.f32.mxu1 %v1755_v44  ;;  %v1757_v3 = vadd.f32 %v4190_v46, %v1681_v42  ;;  %v1607_v16 = vmul.f32 %v2777_v11, %v4721_v37  ;;  %v1606_v33 = vmul.f32 %v2777_v11, %v4722_v63  ;;  %v1756_v49 = vadd.f32 %v4187_v61, %v1680_v45  ;;  %v4727_v37 = vld [vmem:[#allocation26_spill] sm:$0xff] }
 0x319   : > { %v1521_v25 = vadd.f32 1e-05, %v1489_v9  ;;  %v1494_v53 = vadd.f32 1e-05, %v1462_v12  ;;  %v4726_v12 = vld [vmem:[#allocation27_spill] sm:$0xff] }
 0x31a   : > { %1988 = vmatmul.mubr.f32.gmra.mrb[36].mxu1 %v1754_v2  ;;  %v1452_v55 = vpop.xlane.xlu1 %1451  ;;  %v1371_v57 = vpop.xlane.xlu0 %1370  ;;  %v1683_v29 = vmul.f32 %v4183_v19, %v1607_v16  ;;  %v1682_v50 = vmul.f32 %v4180_v59, %v1606_v33 }
 0x31b   : > { %v2779_v18 = vpop.eup %2778  ;;  %2782 = vrsqrt.f32 %v1521_v25  ;;  %v1490_v60 = vmul.f32 0.00390625, %v1452_v55  ;;  %v1463_v39 = vmul.f32 0.00390625, %v1371_v57  ;;  %1992 = vmatprep.mubr.f32.mxu1 %v1757_v3  ;;  %v4728_v25 = vld [vmem:[#allocation29_spill] sm:$0xff]  ;;  %v4729_v55 = vld [vmem:[#allocation28_spill] sm:$0xff] }
 0x31c   : > { %2784 = vrsqrt.f32 %v1494_v53  ;;  %v1759_v52 = vadd.f32 %v4190_v46, %v1683_v29  ;;  %v1609_v36 = vmul.f32 %v2779_v18, %v4107_v27  ;;  %v1608_v0 = vmul.f32 %v2779_v18, %v4104_v43 }
 0x31d   : > { %v1522_v30 = vadd.f32 1e-05, %v1490_v60  ;;  %v1495_v34 = vadd.f32 1e-05, %v1463_v39  ;;  %v1758_v35 = vadd.f32 %v4187_v61, %v1682_v50 }
 0x31e   : > { %1993 = vmatmul.mubr.f32.gmra.mrb[38].mxu1 %v1756_v49  ;;  %v1455_v7 = vpop.xlane.xlu1 %1454  ;;  %v1685_v31 = vmul.f32 %v4183_v19, %v1609_v36  ;;  %v1684_v5 = vmul.f32 %v4180_v59, %v1608_v0  ;;  %v4730_v36 = vld [vmem:[#allocation25_spill] sm:$0xff] }
 0x31f   : > { %2786 = vrsqrt.f32 %v1522_v30  ;;  %v1491_v32 = vmul.f32 0.00390625, %v1455_v7  ;;  %1997 = vmatprep.mubr.f32.mxu1 %v1759_v52  ;;  %v4731_v7 = vld [vmem:[#allocation24_spill] sm:$0xff] }
 0x320   : > { %2788 = vrsqrt.f32 %v1495_v34  ;;  %v1761_v26 = vadd.f32 %v4190_v46, %v1685_v31  ;;  %v1760_v4 = vadd.f32 %v4187_v61, %v1684_v5 }
 0x321   : > { %v2781_v28 = vpop.eup %2780  ;;  %v1523_v27 = vadd.f32 1e-05, %v1491_v32 }
 0x322   : > { %1998 = vmatmul.mubr.f32.gmra.mrb[40].mxu1 %v1758_v35  ;;  %v1611_v43 = vmul.f32 %v2781_v28, %v4123_v47  ;;  %v1610_v58 = vmul.f32 %v2781_v28, %v4120_v10  ;;  %v4724_v47 = vld [vmem:[#allocation22_spill] sm:$0xff]  ;;  %v4725_v10 = vld [vmem:[#allocation23_spill] sm:$0xff] }
 0x323   : > { %2790 = vrsqrt.f32 %v1523_v27  ;;  %2002 = vmatprep.mubr.f32.mxu1 %v1761_v26 }
 0x324   : > { %v1687_v62 = vmul.f32 %v4183_v19, %v1611_v43  ;;  %v1686_v17 = vmul.f32 %v4180_v59, %v1610_v58 }
 0x325   : > { %v2783_v24 = vpop.eup %2782 }
 0x326   : > { %v2785_v6 = vpop.eup %2784  ;;  %2003 = vmatmul.mubr.f32.gmra.mrb[42].mxu1 %v1760_v4  ;;  %v1763_v23 = vadd.f32 %v4190_v46, %v1687_v62  ;;  %v1762_v54 = vadd.f32 %v4187_v61, %v1686_v17  ;;  %v1613_v1 = vmul.f32 %v2783_v24, %v4141_v48  ;;  %v1612_v41 = vmul.f32 %v2783_v24, %v4723_v14 }
 0x327   : > { %v1558_v56 = vmul.f32 %v2785_v6, %v4724_v47  ;;  %v1559_v38 = vmul.f32 %v2785_v6, %v4725_v10  ;;  %v4732_v47 = vld [vmem:[#allocation31_spill] sm:$0xff] }
 0x328   : > { %2007 = vmatprep.mubr.f32.mxu1 %v1763_v23  ;;  %v1689_v51 = vmul.f32 %v4183_v19, %v1613_v1  ;;  %v1688_v44 = vmul.f32 %v4180_v59, %v1612_v41 }
 0x329   : > { %v2787_v2 = vpop.eup %2786  ;;  %v1635_v42 = vmul.f32 %v4183_v19, %v1559_v38  ;;  %v1634_v45 = vmul.f32 %v4180_v59, %v1558_v56 }
 0x32a   : > { %v2789_v11 = vpop.eup %2788  ;;  %2008 = vmatmul.mubr.f32.gmra.mrb[44].mxu1 %v1762_v54  ;;  %v1765_v48 = vadd.f32 %v4190_v46, %v1689_v51  ;;  %v1764_v9 = vadd.f32 %v4187_v61, %v1688_v44  ;;  %v1615_v3 = vmul.f32 %v2787_v2, %v4726_v12  ;;  %v1614_v16 = vmul.f32 %v2787_v2, %v4727_v37 }
 0x32b   : > { %v1711_v63 = vadd.f32 %v4190_v46, %v1635_v42  ;;  %v1710_v33 = vadd.f32 %v4187_v61, %v1634_v45  ;;  %v1561_v53 = vmul.f32 %v2789_v11, %v4728_v25  ;;  %v1560_v57 = vmul.f32 %v2789_v11, %v4729_v55 }
 0x32c   : > { %2012 = vmatprep.mubr.f32.mxu1 %v1765_v48  ;;  %v1691_v49 = vmul.f32 %v4183_v19, %v1615_v3  ;;  %v1690_v29 = vmul.f32 %v4180_v59, %v1614_v16 }
 0x32d   : > { %v2791_v50 = vpop.eup %2790  ;;  %1877 = vmatprep.mubr.f32.mxu0 %v1711_v63  ;;  %v1637_v18 = vmul.f32 %v4183_v19, %v1561_v53  ;;  %v1636_v60 = vmul.f32 %v4180_v59, %v1560_v57 }
 0x32e   : > { %1878 = vmatmul.mubr.f32.vlgmr.msra.gmra.mrb[64].mxu0 %v1710_v33  ;;  %2013 = vmatmul.mubr.f32.gmra.mrb[46].mxu1 %v1764_v9  ;;  %v1767_v39 = vadd.f32 %v4190_v46, %v1691_v49  ;;  %v1766_v52 = vadd.f32 %v4187_v61, %v1690_v29  ;;  %v1617_v30 = vmul.f32 %v2791_v50, %v4730_v36 }
 0x32f   : > { %v1713_v34 = vadd.f32 %v4190_v46, %v1637_v18  ;;  %v1712_v0 = vadd.f32 %v4187_v61, %v1636_v60  ;;  %v1616_v35 = vmul.f32 %v2791_v50, %v4731_v7  ;;  %v2801_v18 = vld [vmem:[%s3226_s15 + $0x28] sm:$0xff] }
 0x330   : > { %2017 = vmatprep.mubr.f32.mxu1 %v1767_v39  ;;  %v1693_v31 = vmul.f32 %v4183_v19, %v1617_v30  ;;  %v2802_v30 = vld [vmem:[%s3226_s15 + $0x30] sm:$0xff] }
 0x331   : > { %1882 = vmatprep.mubr.f32.mxu0 %v1713_v34  ;;  %v1692_v32 = vmul.f32 %v4180_v59, %v1616_v35 }
 0x332   : > { %1883 = vmatmul.mubr.f32.gmra.mrb[66].mxu0 %v1712_v0  ;;  %2018 = vmatmul.mubr.f32.gmra.mrb[48].mxu1 %v1766_v52  ;;  %v1769_v5 = vadd.f32 %v4190_v46, %v1693_v31  ;;  %v2803_v31 = vld [vmem:[%s3226_s15 + $0x38] sm:$0xff] }
 0x333   : > { %v1768_v26 = vadd.f32 %v4187_v61, %v1692_v32 }
 0x334   : > { %2022 = vmatprep.mubr.f32.mxu1 %v1769_v5 }
 0x336   : > { %2023 = vmatmul.mubr.f32.gmra.mrb[50].mxu1 %v1768_v26 }
 0x35f   : > { %v1458_v28 = vpop.xlane.xlu1 %1457 }
 0x360   : > { %v1492_v27 = vmul.f32 0.00390625, %v1458_v28 }
 0x362   : > { %v1524_v4 = vadd.f32 1e-05, %v1492_v27  ;;  %v2804_v27 = vld [vmem:[%s3226_s15 + $0x40] sm:$0xff] }
 0x363   : > { %v1374_v43 = vpop.xlane.xlu0 %1373 }
 0x364   : > { %2792 = vrsqrt.f32 %v1524_v4  ;;  %v1464_v58 = vmul.f32 0.00390625, %v1374_v43 }
 0x366   : > { %v1496_v62 = vadd.f32 1e-05, %v1464_v58 }
 0x368   : > { %2794 = vrsqrt.f32 %v1496_v62  ;;  %v1377_v17 = vpop.xlane.xlu0 %1376 }
 0x369   : > { %v1465_v24 = vmul.f32 0.00390625, %v1377_v17  ;;  %v2805_v17 = vld [vmem:[%s3226_s15 + $0x48] sm:$0xff] }
 0x36b   : > { %v1497_v6 = vadd.f32 1e-05, %v1465_v24  ;;  %v1461_v23 = vpop.xlane.xlu1 %1460 }
 0x36c   : > { %v1493_v54 = vmul.f32 0.00390625, %v1461_v23 }
 0x36d   : > { %2796 = vrsqrt.f32 %v1497_v6 }
 0x36e   : > { %v2793_v1 = vpop.eup %2792  ;;  %v1525_v14 = vadd.f32 1e-05, %v1493_v54 }
 0x36f   : > { %v1619_v41 = vmul.f32 %v2793_v1, %v4199_v22  ;;  %v1618_v56 = vmul.f32 %v2793_v1, %v4732_v47  ;;  %v2806_v1 = vld [vmem:[%s3226_s15 + $0x50] sm:$0xff] }
 0x370   : > { %2798 = vrsqrt.f32 %v1525_v14 }
 0x371   : > { %v1695_v10 = vmul.f32 %v4183_v19, %v1619_v41  ;;  %v1694_v38 = vmul.f32 %v4180_v59, %v1618_v56 }
 0x372   : > { %v2795_v51 = vpop.eup %2794 }
 0x373   : > { %v1771_v44 = vadd.f32 %v4190_v46, %v1695_v10  ;;  %v1770_v2 = vadd.f32 %v4187_v61, %v1694_v38  ;;  %v1563_v42 = vmul.f32 %v2795_v51, %v4215_v8  ;;  %v1562_v45 = vmul.f32 %v2795_v51, %v4212_v21  ;;  %v2807_v10 = vld [vmem:[%s3226_s15 + $0x58] sm:$0xff] }
 0x375   : > { %2027 = vmatprep.mubr.f32.mxu1 %v1771_v44  ;;  %v1639_v11 = vmul.f32 %v4183_v19, %v1563_v42  ;;  %v1638_v22 = vmul.f32 %v4180_v59, %v1562_v45  ;;  %v2808_v42 = vld [vmem:[%s3226_s15 + $0x60] sm:$0xff] }
 0x376   : > { %2028 = vmatmul.mubr.f32.gmra.mrb[52].mxu1 %v1770_v2 }
 0x377   : > { %v2797_v48 = vpop.eup %2796  ;;  %v1715_v9 = vadd.f32 %v4190_v46, %v1639_v11  ;;  %v1714_v12 = vadd.f32 %v4187_v61, %v1638_v22 }
 0x378   : > { %v1565_v3 = vmul.f32 %v2797_v48, %v4231_v20  ;;  %v1564_v37 = vmul.f32 %v2797_v48, %v4228_v15 }
 0x379   : > { %1887 = vmatprep.mubr.f32.mxu0 %v1715_v9  ;;  %v2809_v9 = vld [vmem:[%s3226_s15 + $0x68] sm:$0xff] }
 0x37a   : > { %v2799_v16 = vpop.eup %2798  ;;  %1888 = vmatmul.mubr.f32.gmra.mrb[68].mxu0 %v1714_v12  ;;  %v1641_v21 = vmul.f32 %v4183_v19, %v1565_v3  ;;  %v1640_v8 = vmul.f32 %v4180_v59, %v1564_v37 }
 0x37b   : > { %v1621_v63 = vmul.f32 %v2799_v16, %v4246_v13  ;;  %v1620_v33 = vmul.f32 %v2799_v16, %v4243_v40  ;;  %v4426_v40 = vld [vmem:[%s4585_s6] ss:$0 sm:$0xff] }
 0x37c   : > { %v1717_v25 = vadd.f32 %v4190_v46, %v1641_v21  ;;  %v1716_v53 = vadd.f32 %v4187_v61, %v1640_v8  ;;  %v2810_v21 = vld [vmem:[%s3226_s15 + $0x70] sm:$0xff] }
 0x37d   : > { %v1697_v20 = vmul.f32 %v4183_v19, %v1621_v63  ;;  %v1696_v15 = vmul.f32 %v4180_v59, %v1620_v33  ;;  %v2800_v59 = vld [vmem:[%s3226_s15 + $0x20] sm:$0xff] }
 0x37e   : > { %1892 = vmatprep.mubr.f32.mxu0 %v1717_v25 }
 0x37f   : > { %1893 = vmatmul.mubr.f32.gmra.mrb[70].mxu0 %v1716_v53  ;;  %v1773_v55 = vadd.f32 %v4190_v46, %v1697_v20  ;;  %v1772_v57 = vadd.f32 %v4187_v61, %v1696_v15  ;;  %v2811_v53 = vld [vmem:[%s3226_s15 + $0x78] sm:$0xff] }
 0x381   : > { %2032 = vmatprep.mubr.f32.mxu1 %v1773_v55 }
 0x382   : > { %2033 = vmatmul.mubr.f32.gmra.mrb[54].mxu1 %v1772_v57 }
 0x3a3   : > { %v1899_v13 = vpop.f32.mrb[0].mxu1 }
 0x3a4   : > { %v1900_v19 = vadd.f32 %v4426_v40, %v1899_v13  ;;  %v1901_v49 = vpop.f32.mrb[1].mxu1  ;;  %v2812_v13 = vld [vmem:[%s3226_s15 + $0x80] sm:$0xff] }
 0x3a6   : > { %v2042_v29 = vadd.f32 %v2800_v59, %v1900_v19 }
 0x3a7   : > { %v1904_v50 = vpop.f32.mrb[2].mxu1 }
 0x3a8   : > { %2074 = vst [vmem:[%s4432_s21 + $0x20] sm:$0xff] %v2042_v29  ;;  %v1905_v61 = vadd.f32 %v4426_v40, %v1904_v50  ;;  %v1906_v46 = vpop.f32.mrb[3].mxu1  ;;  %v2813_v50 = vld [vmem:[%s3226_s15 + $0x88] sm:$0xff] }
 0x3aa   : > { %v2043_v60 = vadd.f32 %v2801_v18, %v1905_v61 }
 0x3ab   : > { %v1909_v39 = vpop.f32.mrb[4].mxu1 }
 0x3ac   : > { %2075 = vst [vmem:[%s4432_s21 + $0x28] sm:$0xff] %v2043_v60  ;;  %v1910_v52 = vadd.f32 %v4426_v40, %v1909_v39  ;;  %v1911_v36 = vpop.f32.mrb[5].mxu1  ;;  %v2814_v39 = vld [vmem:[%s3226_s15 + $0x90] sm:$0xff] }
 0x3ae   : > { %v2044_v34 = vadd.f32 %v2802_v30, %v1910_v52 }
 0x3af   : > { %v1914_v0 = vpop.f32.mrb[6].mxu1 }
 0x3b0   : > { %2076 = vst [vmem:[%s4432_s21 + $0x30] sm:$0xff] %v2044_v34  ;;  %v1915_v7 = vadd.f32 %v4426_v40, %v1914_v0  ;;  %v1916_v35 = vpop.f32.mrb[7].mxu1  ;;  %v2815_v0 = vld [vmem:[%s3226_s15 + $0x98] sm:$0xff] }
 0x3b2   : > { %v2045_v32 = vadd.f32 %v2803_v31, %v1915_v7 }
 0x3b4   : > { %2077 = vst [vmem:[%s4432_s21 + $0x38] sm:$0xff] %v2045_v32  ;;  %v1919_v5 = vpop.f32.mrb[8].mxu1 }
 0x3b5   : > { %v1920_v26 = vadd.f32 %v4426_v40, %v1919_v5  ;;  %v1921_v28 = vpop.f32.mrb[9].mxu1  ;;  %v2816_v5 = vld [vmem:[%s3226_s15 + $0xa0] sm:$0xff] }
 0x3b7   : > { %v2046_v4 = vadd.f32 %v2804_v27, %v1920_v26 }
 0x3b8   : > { %v1924_v43 = vpop.f32.mrb[10].mxu1 }
 0x3b9   : > { %2078 = vst [vmem:[%s4432_s21 + $0x40] sm:$0xff] %v2046_v4  ;;  %v1925_v58 = vadd.f32 %v4426_v40, %v1924_v43  ;;  %v1926_v62 = vpop.f32.mrb[11].mxu1  ;;  %v2817_v43 = vld [vmem:[%s3226_s15 + $0xa8] sm:$0xff] }
 0x3bb   : > { %v2047_v24 = vadd.f32 %v2805_v17, %v1925_v58 }
 0x3bc   : > { %v1929_v6 = vpop.f32.mrb[12].mxu1 }
 0x3bd   : > { %2079 = vst [vmem:[%s4432_s21 + $0x48] sm:$0xff] %v2047_v24  ;;  %v1930_v23 = vadd.f32 %v4426_v40, %v1929_v6  ;;  %v1931_v54 = vpop.f32.mrb[13].mxu1  ;;  %v2818_v6 = vld [vmem:[%s3226_s15 + $0xb0] sm:$0xff] }
 0x3bf   : > { %v2048_v14 = vadd.f32 %v2806_v1, %v1930_v23 }
 0x3c0   : > { %v1934_v41 = vpop.f32.mrb[14].mxu1 }
 0x3c1   : > { %2080 = vst [vmem:[%s4432_s21 + $0x50] sm:$0xff] %v2048_v14  ;;  %v1935_v47 = vadd.f32 %v4426_v40, %v1934_v41  ;;  %v1936_v56 = vpop.f32.mrb[15].mxu1  ;;  %v2819_v41 = vld [vmem:[%s3226_s15 + $0xb8] sm:$0xff] }
 0x3c3   : > { %v2049_v38 = vadd.f32 %v2807_v10, %v1935_v47 }
 0x3c4   : > { %v1939_v51 = vpop.f32.mrb[16].mxu1 }
 0x3c5   : > { %2081 = vst [vmem:[%s4432_s21 + $0x58] sm:$0xff] %v2049_v38  ;;  %v1940_v44 = vadd.f32 %v4426_v40, %v1939_v51  ;;  %v1941_v2 = vpop.f32.mrb[17].mxu1  ;;  %v2820_v51 = vld [vmem:[%s3226_s15 + $0xc0] sm:$0xff] }
 0x3c7   : > { %v2050_v45 = vadd.f32 %v2808_v42, %v1940_v44 }
 0x3c8   : > { %v1944_v11 = vpop.f32.mrb[18].mxu1 }
 0x3c9   : > { %2082 = vst [vmem:[%s4432_s21 + $0x60] sm:$0xff] %v2050_v45  ;;  %v1945_v22 = vadd.f32 %v4426_v40, %v1944_v11  ;;  %v1946_v48 = vpop.f32.mrb[19].mxu1  ;;  %v2821_v11 = vld [vmem:[%s3226_s15 + $0xc8] sm:$0xff] }
 0x3cb   : > { %v2051_v12 = vadd.f32 %v2809_v9, %v1945_v22 }
 0x3cd   : > { %2083 = vst [vmem:[%s4432_s21 + $0x68] sm:$0xff] %v2051_v12  ;;  %v1949_v3 = vpop.f32.mrb[20].mxu1 }
 0x3ce   : > { %v1950_v37 = vadd.f32 %v4426_v40, %v1949_v3  ;;  %v1951_v16 = vpop.f32.mrb[21].mxu1  ;;  %v2822_v3 = vld [vmem:[%s3226_s15 + $0xd0] sm:$0xff] }
 0x3d0   : > { %v2052_v8 = vadd.f32 %v2810_v21, %v1950_v37 }
 0x3d1   : > { %v1954_v63 = vpop.f32.mrb[22].mxu1 }
 0x3d2   : > { %2084 = vst [vmem:[%s4432_s21 + $0x70] sm:$0xff] %v2052_v8  ;;  %v1955_v33 = vadd.f32 %v4426_v40, %v1954_v63  ;;  %v1956_v25 = vpop.f32.mrb[23].mxu1 }
 0x3d4   : > { %v2053_v20 = vadd.f32 %v2811_v53, %v1955_v33  ;;  %v2823_v53 = vld [vmem:[%s3226_s15] sm:$0xff] }
 0x3d5   : > { %v1959_v15 = vpop.f32.mrb[24].mxu1 }
 0x3d6   : > { %2085 = vst [vmem:[%s4432_s21 + $0x78] sm:$0xff] %v2053_v20  ;;  %v1960_v55 = vadd.f32 %v4426_v40, %v1959_v15  ;;  %v1961_v57 = vpop.f32.mrb[25].mxu1  ;;  %v2824_v15 = vld [vmem:[%s3226_s15 + $0xd8] sm:$0xff] }
 0x3d8   : > { %v2054_v19 = vadd.f32 %v2812_v13, %v1960_v55 }
 0x3d9   : > { %v1964_v49 = vpop.f32.mrb[26].mxu1 }
 0x3da   : > { %2086 = vst [vmem:[%s4432_s21 + $0x80] sm:$0xff] %v2054_v19  ;;  %v1965_v59 = vadd.f32 %v4426_v40, %v1964_v49  ;;  %v1966_v29 = vpop.f32.mrb[27].mxu1 }
 0x3dc   : > { %v2055_v61 = vadd.f32 %v2813_v50, %v1965_v59  ;;  %v2825_v50 = vld [vmem:[%s3226_s15 + $0x8] sm:$0xff] }
 0x3dd   : > { %v1969_v46 = vpop.f32.mrb[28].mxu1 }
 0x3de   : > { %2087 = vst [vmem:[%s4432_s21 + $0x88] sm:$0xff] %v2055_v61  ;;  %v1970_v18 = vadd.f32 %v4426_v40, %v1969_v46  ;;  %v1971_v60 = vpop.f32.mrb[29].mxu1  ;;  %v2826_v46 = vld [vmem:[%s3226_s15 + $0xe0] sm:$0xff] }
 0x3e0   : > { %v2056_v52 = vadd.f32 %v2814_v39, %v1970_v18 }
 0x3e1   : > { %v1974_v36 = vpop.f32.mrb[30].mxu1 }
 0x3e2   : > { %2088 = vst [vmem:[%s4432_s21 + $0x90] sm:$0xff] %v2056_v52  ;;  %v1975_v30 = vadd.f32 %v4426_v40, %v1974_v36  ;;  %v1976_v34 = vpop.f32.mrb[31].mxu1  ;;  %v2827_v36 = vld [vmem:[%s3226_s15 + $0xe8] sm:$0xff] }
 0x3e4   : > { %v2057_v7 = vadd.f32 %v2815_v0, %v1975_v30 }
 0x3e5   : > { %v1979_v35 = vpop.f32.mrb[32].mxu1 }
 0x3e6   : > { %2089 = vst [vmem:[%s4432_s21 + $0x98] sm:$0xff] %v2057_v7  ;;  %v1980_v31 = vadd.f32 %v4426_v40, %v1979_v35  ;;  %v1981_v32 = vpop.f32.mrb[33].mxu1  ;;  %v2828_v35 = vld [vmem:[%s3226_s15 + $0xf0] sm:$0xff] }
 0x3e8   : > { %v2058_v26 = vadd.f32 %v2816_v5, %v1980_v31 }
 0x3e9   : > { %v1984_v28 = vpop.f32.mrb[34].mxu1 }
 0x3ea   : > { %2090 = vst [vmem:[%s4432_s21 + $0xa0] sm:$0xff] %v2058_v26  ;;  %v1985_v27 = vadd.f32 %v4426_v40, %v1984_v28  ;;  %v1986_v4 = vpop.f32.mrb[35].mxu1  ;;  %v2829_v28 = vld [vmem:[%s3226_s15 + $0x10] sm:$0xff] }
 0x3ec   : > { %v2059_v58 = vadd.f32 %v2817_v43, %v1985_v27 }
 0x3ed   : > { %v1989_v62 = vpop.f32.mrb[36].mxu1 }
 0x3ee   : > { %2091 = vst [vmem:[%s4432_s21 + $0xa8] sm:$0xff] %v2059_v58  ;;  %v1990_v17 = vadd.f32 %v4426_v40, %v1989_v62  ;;  %v1991_v24 = vpop.f32.mrb[37].mxu1  ;;  %v2830_v62 = vld [vmem:[%s3226_s15 + $0x18] sm:$0xff] }
 0x3f0   : > { %v2060_v23 = vadd.f32 %v2818_v6, %v1990_v17 }
 0x3f1   : > { %v1994_v54 = vpop.f32.mrb[38].mxu1 }
 0x3f2   : > { %2092 = vst [vmem:[%s4432_s21 + $0xb0] sm:$0xff] %v2060_v23  ;;  %v1995_v1 = vadd.f32 %v4426_v40, %v1994_v54  ;;  %v1996_v14 = vpop.f32.mrb[39].mxu1  ;;  %v2831_v54 = vld [vmem:[%s3226_s15 + $0xf8] sm:$0xff] }
 0x3f4   : > { %v2061_v47 = vadd.f32 %v2819_v41, %v1995_v1 }
 0x3f5   : > { %v1999_v56 = vpop.f32.mrb[40].mxu1 }
 0x3f6   : > { %2093 = vst [vmem:[%s4432_s21 + $0xb8] sm:$0xff] %v2061_v47  ;;  %v2000_v10 = vadd.f32 %v4426_v40, %v1999_v56  ;;  %v2001_v38 = vpop.f32.mrb[41].mxu1 }
 0x3f8   : > { %v2062_v44 = vadd.f32 %v2820_v51, %v2000_v10 }
 0x3f9   : > { %v2004_v2 = vpop.f32.mrb[42].mxu1 }
 0x3fa   : > { %2094 = vst [vmem:[%s4432_s21 + $0xc0] sm:$0xff] %v2062_v44  ;;  %v2005_v42 = vadd.f32 %v4426_v40, %v2004_v2  ;;  %v2006_v45 = vpop.f32.mrb[43].mxu1 }
 0x3fc   : > { %v2063_v22 = vadd.f32 %v2821_v11, %v2005_v42 }
 0x3fd   : > { %v2009_v48 = vpop.f32.mrb[44].mxu1 }
 0x3fe   : > { %2095 = vst [vmem:[%s4432_s21 + $0xc8] sm:$0xff] %v2063_v22  ;;  %v2010_v9 = vadd.f32 %v4426_v40, %v2009_v48  ;;  %v2011_v12 = vpop.f32.mrb[45].mxu1 }
 0x400   : > { %v2064_v37 = vadd.f32 %v2822_v3, %v2010_v9 }
 0x401   : > { %v1879_v16 = vpop.f32.mrb[64].mxu0  ;;  %v2014_v21 = vpop.f32.mrb[46].mxu1 }
 0x402   : > { %2096 = vst [vmem:[%s4432_s21 + $0xd0] sm:$0xff] %v2064_v37  ;;  %v1880_v8 = vadd.f32 %v4426_v40, %v1879_v16  ;;  %v2015_v63 = vadd.f32 %v4426_v40, %v2014_v21  ;;  %v1881_v33 = vpop.f32.mrb[65].mxu0  ;;  %v2016_v25 = vpop.f32.mrb[47].mxu1 }
 0x404   : > { %v2038_v20 = vadd.f32 %v2823_v53, %v1880_v8  ;;  %v2065_v55 = vadd.f32 %v2824_v15, %v2015_v63 }
 0x405   : > { %v1884_v57 = vpop.f32.mrb[66].mxu0  ;;  %v2019_v13 = vpop.f32.mrb[48].mxu1 }
 0x406   : > { %2070 = vst [vmem:[%s4432_s21] sm:$0xff] %v2038_v20  ;;  %2097 = vst [vmem:[%s4432_s21 + $0xd8] sm:$0xff] %v2065_v55  ;;  %v1885_v19 = vadd.f32 %v4426_v40, %v1884_v57  ;;  %v2020_v49 = vadd.f32 %v4426_v40, %v2019_v13  ;;  %v1886_v59 = vpop.f32.mrb[67].mxu0  ;;  %v2021_v29 = vpop.f32.mrb[49].mxu1 }
 0x408   : > { %v2039_v61 = vadd.f32 %v2825_v50, %v1885_v19  ;;  %v2066_v18 = vadd.f32 %v2826_v46, %v2020_v49 }
 0x409   : > { %v2024_v60 = vpop.f32.mrb[50].mxu1 }
 0x40a   : > { %2071 = vst [vmem:[%s4432_s21 + $0x8] sm:$0xff] %v2039_v61  ;;  %2098 = vst [vmem:[%s4432_s21 + $0xe0] sm:$0xff] %v2066_v18  ;;  %v2025_v39 = vadd.f32 %v4426_v40, %v2024_v60  ;;  %v2026_v52 = vpop.f32.mrb[51].mxu1 }
 0x40c   : > { %v2067_v30 = vadd.f32 %v2827_v36, %v2025_v39 }
 0x40e   : > { %2099 = vst [vmem:[%s4432_s21 + $0xe8] sm:$0xff] %v2067_v30 }
 0x449   : > { %v2029_v34 = vpop.f32.mrb[52].mxu1 }
 0x44a   : > { %v2030_v0 = vadd.f32 %v4426_v40, %v2029_v34  ;;  %v2031_v7 = vpop.f32.mrb[53].mxu1 }
 0x44c   : > { %v2068_v31 = vadd.f32 %v2828_v35, %v2030_v0 }
 0x44d   : > { %v1889_v32 = vpop.f32.mrb[68].mxu0 }
 0x44e   : > { %2100 = vst [vmem:[%s4432_s21 + $0xf0] sm:$0xff] %v2068_v31  ;;  %v1890_v5 = vadd.f32 %v4426_v40, %v1889_v32  ;;  %v1891_v26 = vpop.f32.mrb[69].mxu0 }
 0x450   : > { %v2040_v27 = vadd.f32 %v2829_v28, %v1890_v5 }
 0x452   : > { %2072 = vst [vmem:[%s4432_s21 + $0x10] sm:$0xff] %v2040_v27  ;;  %v1894_v4 = vpop.f32.mrb[70].mxu0 }
 0x453   : > { %v1895_v43 = vadd.f32 %v4426_v40, %v1894_v4  ;;  %v1896_v58 = vpop.f32.mrb[71].mxu0 }
 0x455   : > { %v2041_v17 = vadd.f32 %v2830_v62, %v1895_v43  ;;  %v2034_v24 = vpop.f32.mrb[54].mxu1 }
 0x456   : > { %v2035_v6 = vadd.f32 %v4426_v40, %v2034_v24  ;;  %v2036_v23 = vpop.f32.mrb[55].mxu1 }
 0x457   : > { %2073 = vst [vmem:[%s4432_s21 + $0x18] sm:$0xff] %v2041_v17 }
 0x458   : > { %v2069_v1 = vadd.f32 %v2831_v54, %v2035_v6 }
 0x45a   : > { %2101 = vst [vmem:[%s4432_s21 + $0xf8] sm:$0xff] %v2069_v1 }
 0x45b   : > { %2931 = shalt.err (!%p2928_p2)
}
 0x45c   : > { %s2932_s15 = scalar_lea.hbm %s4531_s9, 4096  ;;  %s2936_s21 = scalar_lea.hbm %s4586_s7, 8192 }
 0x45d   : > { %p2933_p13 = scmp.ne.s32.totalorder %s4531_s9, %s2932_s15  ;;  %p2937_p4 = scmp.lt.u32.totalorder %s4531_s9, %s4586_s7 }
 0x45e   : > { %p2938_p7 = scmp.lt.u32.totalorder %s2936_s21, %s2932_s15  ;;  %p2940_p11 = scmp.lt.u32.totalorder %s2932_s15, %s4531_s9 }
 0x45f   : > { %p2934_p6 = pnand %p2933_p13, %p4733_p0 }
 0x460   : > { %p2939_p8 = por %p2938_p7, %p2937_p4 }
 0x461   : > { %p2935_p10 = pneg %p2934_p6 }
 0x462   : > { %p2941_p1 = por %p2940_p11, %p2939_p8 }
 0x464   : > { %p2942_p3 = pnand %p2941_p1, %p2935_p10 }
 0x466   : > { %2945 = shalt.err (!%p2942_p3)
}
 0x467   : > { %s3000_s30 = smov 128   ;;  %s3001_s23 = smov 8  }
 0x468   : > { %2415 = dma.vmem_to_hbm [thread:$0]  (%p4733_p0), %s4533_s29, 4096, %s4531_s9, %s2103_s28, %s3000_s30, %s3000_s30, %s3001_s23  }
 0x469 PF: > { %s2131_s11 = sand.u32 1, %s2976_s24   ;;  %p4734_p5 = scmp.ne.s32.totalorder %s4637_s8, 0 }
 0x46a   : > { %p4735_p9 = scmp.ge.s32.totalorder %s2988_s27, 2  ;;  %s2132_s10 = scalar_lea.sflag [#allocation4], %s2131_s11 }
 0x46c   : > { %p2429_p12 = pnand %p4735_p9, %p4734_p5 }
 0x46e   : > { %2971 = dma.done.wait (!%p2429_p12), %s2132_s10, 4096  }
 0x46f   : > { %2973 = vsyncadd (!%p2429_p12), %s2132_s10, 4294963200  ;;  %p21_p2 = scmp.ge.s32.totalorder %s3155_s13, 4   ;;  %s4736_s24 = smov %s2980_s25 }
 0x470   : > { %s4737_s25 = smov %s2984_s26  ;;  %s4738_s26 = smov %s3164_s17 }
 0x471   : > { %s4739_s27 = smov %s3155_s13  ;;  %23 = sbr.rel (!%p21_p2) target bundleno = 6 (0x6), region = 101 }
 0x478   :  { %2137 = vsyncpa [#allocation3], 1 }
 0x479   :  { %2139 = vsyncpa [#allocation3 + $0x1], 1 }
 0x47a   :  { %2140 = vsyncpa [#allocation6], 1 }
 0x47b   :  { %2141 = vsyncpa [#allocation4], 1 }
 0x47c   :  { %2143 = vsyncpa [#allocation4 + $0x1], 1 }

</bundles_post_ra>
